<compile_context>
chip_gen: v5e
topology: v5e:2x2
jax: 0.10.0
libtpu: 0.0.40
codegen_flags: <defaults>
</compile_context>

<pallas_src>
import jax
import jax.numpy as jnp
from jax.experimental import pallas as pl
from jax.experimental.pallas import tpu as pltpu


def _round_up(x, m):
    return (x + m - 1) // m * m


def _cdiv(a, b):
    return (a + b - 1) // b


def _blk_vmem_bytes(shape, dtype):
    """Pessimistic VMEM footprint of one block, incl. (sublane, lane) padding."""
    itemsize = jnp.dtype(dtype).itemsize
    sublane = 8 * max(1, 4 // itemsize)          # f32 -> 8, bf16 -> 16
    s = [int(d) for d in shape]
    lead = 1
    for d in s[:-2]:
        lead *= d
    snd = _round_up(s[-2], sublane) if len(s) >= 2 else 1
    lst = _round_up(s[-1], 128)
    return lead * snd * lst * itemsize


def conv_bn_relu(x, weight, gamma, beta, running_mean, running_var, *,
                 stride=1, padding=0, eps=1e-5,
                 compute_dtype=jnp.bfloat16, block_rows=512):
    """Fused Conv2d(bias=False) + BatchNorm2d(eval) + ReLU.

    x:      (N, Ci, H, W)   NCHW, matching the PyTorch module
    weight: (Co, Ci, ks, ks)
    gamma/beta/running_mean/running_var: (Co,)
    """
    N, Ci, H, W = x.shape
    Co, Ciw, ks, ks2 = weight.shape
    assert Ciw == Ci and ks == ks2
    Ho = (H + 2 * padding - ks) // stride + 1
    Wo = (W + 2 * padding - ks) // stride + 1

    # ---- fold eval-mode BatchNorm into a per-channel scale + bias (f32) ----
    scale = gamma.astype(jnp.float32) / jnp.sqrt(
        running_var.astype(jnp.float32) + eps)
    bias = beta.astype(jnp.float32) - running_mean.astype(jnp.float32) * scale

    # ---- lane-dense output channels (256 when large: v6e/v7x 256x256 MXU) --
    lane = 256 if Co > 128 else 128
    Cop = _round_up(Co, lane)
    Cot = min(Cop, 256)                  # Co tile (bounds weight VMEM on v7x)
    n_co = Cop // Cot

    # ---- folded weights: (Co,Ci,ks,ks) -> (ks*ks, Ci, Cop), compute dtype --
    w = weight.astype(jnp.float32) * scale[:, None, None, None]
    w = jnp.transpose(w, (2, 3, 1, 0)).reshape(ks * ks, Ci, Co)
    w_pad = jnp.zeros((ks * ks, Ci, Cop), jnp.float32).at[:, :, :Co].set(w)
    w_pad = w_pad.astype(compute_dtype)
    b_pad = jnp.zeros((1, Cop), jnp.float32).at[0, :Co].set(bias)

    # ---- output-row banding: patches are formed in VMEM, never in HBM ------
    TH = max(1, min(Ho, block_rows // max(1, Wo)))   # output rows per band
    n_hb = _cdiv(Ho, TH)
    NB = N * n_hb
    THb = (TH - 1) * stride + ks          # input rows per band (with halo)
    Wpi = (Wo - 1) * stride + ks          # input cols actually read
    Hp_needed = (n_hb * TH - 1) * stride + ks

    xn = jnp.transpose(x, (0, 2, 3, 1)).astype(compute_dtype)      # NHWC
    pad_bot = max(0, Hp_needed - (H + padding))
    pad_rgt = max(0, Wpi - (W + padding))
    xp = jnp.pad(xn, ((0, 0), (padding, pad_bot), (padding, pad_rgt), (0, 0)))
    Wp_arr = W + padding + pad_rgt

    # Overlapping row bands: ~(1 + (ks-1)/TH)x copy of the input (vs ks^2 x
    # for an HBM im2col).  Band b holds input rows needed by output rows
    # [b*TH, (b+1)*TH).
    xb = jnp.stack([xp[:, b * TH * stride: b * TH * stride + THb]
                    for b in range(n_hb)], axis=1)
    xb = xb.reshape(NB, THb, Wp_arr, Ci)

    out_dtype = x.dtype
    M = TH * Wo                            # matmul rows per grid step

    # ---- kernel: ks*ks shifted matmuls from the VMEM row band --------------
    def kernel(x_ref, w_ref, b_ref, o_ref):
        band = x_ref[0]                            # (THb, Wp_arr, Ci)
        acc = jnp.zeros((M, Cot), jnp.float32)
        for dy in range(ks):
            for dx in range(ks):
                if stride == 1:
                    v = band[dy:dy + TH, dx:dx + Wo, :]
                else:
                    v = jax.lax.slice(
                        band, (dy, dx, 0),
                        (dy + (TH - 1) * stride + 1,
                         dx + (Wo - 1) * stride + 1, Ci),
                        (stride, stride, 1))
                acc = acc + jnp.dot(v.reshape(M, Ci), w_ref[dy * ks + dx],
                                    preferred_element_type=jnp.float32)
        acc = acc + b_ref[...]                     # f32 epilogue (v5e-safe)
        o_ref[0] = jnp.maximum(acc, 0.0).astype(o_ref.dtype)

    # ---- VMEM budget (padded tile footprint, 2x headroom, 32-64 MiB) -------
    footprint = (
        2 * _blk_vmem_bytes((1, THb, Wp_arr, Ci), compute_dtype)   # x (dbl buf)
        + 1 * _blk_vmem_bytes((ks * ks, Ci, Cot), compute_dtype)   # w (single)
        + 1 * _blk_vmem_bytes((1, Cot), jnp.float32)               # bias
        + 2 * _blk_vmem_bytes((1, M, Cot), out_dtype)              # out (dbl)
        + 2 * _blk_vmem_bytes((M, Cot), jnp.float32))              # f32 acc
    vmem_limit = int(min(max(2 * footprint, 32 * 2 ** 20), 64 * 2 ** 20))

    cost = pl.CostEstimate(
        flops=2 * NB * M * ks * ks * Ci * Cop,
        transcendentals=0,
        bytes_accessed=int(xb.size * jnp.dtype(compute_dtype).itemsize * n_co
                           + w_pad.size * jnp.dtype(compute_dtype).itemsize
                           + b_pad.size * 4
                           + NB * M * Cop * jnp.dtype(out_dtype).itemsize))

    def _call(single_buffer_consts):
        # Constant weight/bias blocks single-buffered halves their VMEM cost.
        extra = ({"pipeline_mode": pl.Buffered(1)}
                 if single_buffer_consts else {})
        return pl.pallas_call(
            kernel,
            out_shape=jax.ShapeDtypeStruct((NB, M, Cop), out_dtype),
            grid_spec=pltpu.PrefetchScalarGridSpec(
                num_scalar_prefetch=0,
                grid=(n_co, NB),          # Co tiles outer, bands inner
                in_specs=[
                    pl.BlockSpec((1, THb, Wp_arr, Ci),
                                 lambda j, b: (b, 0, 0, 0)),
                    pl.BlockSpec((ks * ks, Ci, Cot),
                                 lambda j, b: (0, 0, j), **extra),
                    pl.BlockSpec((1, Cot),
                                 lambda j, b: (0, j), **extra),
                ],
                out_specs=pl.BlockSpec((1, M, Cot), lambda j, b: (b, 0, j)),
            ),
            compiler_params=pltpu.CompilerParams(
                dimension_semantics=("parallel", "parallel"),
                vmem_limit_bytes=vmem_limit),
            cost_estimate=cost,
        )(xb, w_pad, b_pad)

    try:
        out = _call(True)
    except Exception:
        # Fallback if this JAX build rejects single-buffered pipeline_mode.
        out = _call(False)

    out = out.reshape(N, n_hb * TH, Wo, Cop)[:, :Ho, :, :Co]
    return jnp.transpose(out, (0, 3, 1, 2))            # NCHW, already x.dtype


def _reference(x, weight, gamma, beta, running_mean, running_var,
               *, stride=1, padding=0, eps=1e-5):
    """Pure-JAX reference mirroring the PyTorch forward (eval-mode BN)."""
    y = jax.lax.conv_general_dilated(
        x.astype(jnp.float32), weight.astype(jnp.float32),
        window_strides=(stride, stride),
        padding=[(padding, padding), (padding, padding)],
        dimension_numbers=("NCHW", "OIHW", "NCHW"))
    scale = gamma / jnp.sqrt(running_var + eps)
    bias = beta - running_mean * scale
    y = y * scale[None, :, None, None] + bias[None, :, None, None]
    return jnp.maximum(y, 0.0).astype(x.dtype)


if __name__ == "__main__":
    key = jax.random.PRNGKey(0)
    k1, k2, k3, k4, k5, k6 = jax.random.split(key, 6)

    N, Ci, H, W = 2, 4, 16, 16
    Co, ks, stride, padding = 8, 3, 1, 1

    x = jax.random.normal(k1, (N, Ci, H, W), dtype=jnp.float32)
    weight = jax.random.normal(k2, (Co, Ci, ks, ks), dtype=jnp.float32) * 0.1
    gamma = 1.0 + 0.1 * jax.random.normal(k3, (Co,), dtype=jnp.float32)
    beta = 0.1 * jax.random.normal(k4, (Co,), dtype=jnp.float32)
    running_mean = 0.1 * jax.random.normal(k5, (Co,), dtype=jnp.float32)
    running_var = jax.random.uniform(k6, (Co,), dtype=jnp.float32,
                                     minval=0.5, maxval=1.5)

    y_ref = _reference(x, weight, gamma, beta, running_mean, running_var,
                       stride=stride, padding=padding)

    # 1) structural check: f32 operands, small bands (exercises H-band tiling)
    y32 = conv_bn_relu(x, weight, gamma, beta, running_mean, running_var,
                       stride=stride, padding=padding,
                       compute_dtype=jnp.float32, block_rows=64)
    y32 = jax.block_until_ready(y32)
    assert y32.shape == (N, Co, H, W) and y32.dtype == x.dtype
    assert jnp.allclose(y32, y_ref, rtol=1e-4, atol=1e-4), \
        "f32 kernel mismatch vs conv/BN/ReLU reference"

    # 2) performance path: bf16 operands with f32 accumulation
    y = conv_bn_relu(x, weight, gamma, beta, running_mean, running_var,
                     stride=stride, padding=padding)
    y = jax.block_until_ready(y)
    assert y.shape == (N, Co, H, W) and y.dtype == x.dtype
    assert jnp.allclose(y, y_ref, rtol=5e-2, atol=5e-2), \
        "bf16 kernel mismatch vs conv/BN/ReLU reference"

    print("KERNEL_OK")
</pallas_src>

<mosaic_0001>
module attributes {stable_mosaic.version = 11 : i64} {
  func.func @kernel(%arg0: i32, %arg1: i32, %arg2: memref<1x6x18x4xf32, #tpu.memory_space<vmem>>, %arg3: memref<9x4x128xf32, #tpu.memory_space<vmem>>, %arg4: memref<1x128xf32, #tpu.memory_space<vmem>>, %arg5: memref<1x64x128xf32, #tpu.memory_space<vmem>>) attributes {dimension_semantics = [#tpu.dimension_semantics<parallel>, #tpu.dimension_semantics<parallel>], iteration_bounds = array<i64: 1, 8>, scalar_prefetch = 0 : i64, scratch_operands = 0 : i64, tpu.core_type = #tpu.core_type<tc>, window_params = [{transform_indices = @transform_0, window_bounds = array<i64: 1, 6, 18, 4>}, {pipeline_mode = #tpu.pipeline_mode<synchronous>, transform_indices = @transform_1, window_bounds = array<i64: 9, 4, 128>}, {pipeline_mode = #tpu.pipeline_mode<synchronous>, transform_indices = @transform_2, window_bounds = array<i64: 1, 128>}, {transform_indices = @transform_3, window_bounds = array<i64: 1, 64, 128>}]} {
    %c0 = arith.constant 0 : index
    %c0_0 = arith.constant 0 : index
    %c0_1 = arith.constant 0 : index
    %c0_2 = arith.constant 0 : index
    %0 = vector.load %arg2[%c0, %c0_0, %c0_1, %c0_2] : memref<1x6x18x4xf32, #tpu.memory_space<vmem>>, vector<1x6x18x4xf32>
    %1 = vector.shape_cast %0 : vector<1x6x18x4xf32> to vector<6x18x4xf32>
    %cst = arith.constant 0.000000e+00 : f32
    %2 = vector.broadcast %cst : f32 to vector<64x128xf32>
    %3 = vector.extract_strided_slice %1 {offsets = [0, 0, 0], sizes = [4, 16, 4], strides = [1, 1, 1]} : vector<6x18x4xf32> to vector<4x16x4xf32>
    %4 = vector.shape_cast %3 : vector<4x16x4xf32> to vector<64x4xf32>
    %c0_3 = arith.constant 0 : index
    %c0_4 = arith.constant 0 : index
    %c0_5 = arith.constant 0 : index
    %5 = vector.load %arg3[%c0_3, %c0_4, %c0_5] : memref<9x4x128xf32, #tpu.memory_space<vmem>>, vector<1x4x128xf32>
    %6 = vector.shape_cast %5 : vector<1x4x128xf32> to vector<4x128xf32>
    %cst_6 = arith.constant dense<0.000000e+00> : vector<64x128xf32>
    %7 = tpu.matmul %4, %6, %cst_6 {dimension_numbers = #tpu.dot_dimension_numbers<[1], [0], [0], [1], [0, 0, 1, 1], [], []>} : vector<64x4xf32>, vector<4x128xf32>, vector<64x128xf32> -> vector<64x128xf32>
    %8 = arith.addf %2, %7 : vector<64x128xf32>
    %9 = vector.extract_strided_slice %1 {offsets = [0, 1, 0], sizes = [4, 16, 4], strides = [1, 1, 1]} : vector<6x18x4xf32> to vector<4x16x4xf32>
    %10 = vector.shape_cast %9 : vector<4x16x4xf32> to vector<64x4xf32>
    %c1 = arith.constant 1 : index
    %c0_7 = arith.constant 0 : index
    %c0_8 = arith.constant 0 : index
    %11 = vector.load %arg3[%c1, %c0_7, %c0_8] : memref<9x4x128xf32, #tpu.memory_space<vmem>>, vector<1x4x128xf32>
    %12 = vector.shape_cast %11 : vector<1x4x128xf32> to vector<4x128xf32>
    %cst_9 = arith.constant dense<0.000000e+00> : vector<64x128xf32>
    %13 = tpu.matmul %10, %12, %cst_9 {dimension_numbers = #tpu.dot_dimension_numbers<[1], [0], [0], [1], [0, 0, 1, 1], [], []>} : vector<64x4xf32>, vector<4x128xf32>, vector<64x128xf32> -> vector<64x128xf32>
    %14 = arith.addf %8, %13 : vector<64x128xf32>
    %15 = vector.extract_strided_slice %1 {offsets = [0, 2, 0], sizes = [4, 16, 4], strides = [1, 1, 1]} : vector<6x18x4xf32> to vector<4x16x4xf32>
    %16 = vector.shape_cast %15 : vector<4x16x4xf32> to vector<64x4xf32>
    %c2 = arith.constant 2 : index
    %c0_10 = arith.constant 0 : index
    %c0_11 = arith.constant 0 : index
    %17 = vector.load %arg3[%c2, %c0_10, %c0_11] : memref<9x4x128xf32, #tpu.memory_space<vmem>>, vector<1x4x128xf32>
    %18 = vector.shape_cast %17 : vector<1x4x128xf32> to vector<4x128xf32>
    %cst_12 = arith.constant dense<0.000000e+00> : vector<64x128xf32>
    %19 = tpu.matmul %16, %18, %cst_12 {dimension_numbers = #tpu.dot_dimension_numbers<[1], [0], [0], [1], [0, 0, 1, 1], [], []>} : vector<64x4xf32>, vector<4x128xf32>, vector<64x128xf32> -> vector<64x128xf32>
    %20 = arith.addf %14, %19 : vector<64x128xf32>
    %21 = vector.extract_strided_slice %1 {offsets = [1, 0, 0], sizes = [4, 16, 4], strides = [1, 1, 1]} : vector<6x18x4xf32> to vector<4x16x4xf32>
    %22 = vector.shape_cast %21 : vector<4x16x4xf32> to vector<64x4xf32>
    %c3 = arith.constant 3 : index
    %c0_13 = arith.constant 0 : index
    %c0_14 = arith.constant 0 : index
    %23 = vector.load %arg3[%c3, %c0_13, %c0_14] : memref<9x4x128xf32, #tpu.memory_space<vmem>>, vector<1x4x128xf32>
    %24 = vector.shape_cast %23 : vector<1x4x128xf32> to vector<4x128xf32>
    %cst_15 = arith.constant dense<0.000000e+00> : vector<64x128xf32>
    %25 = tpu.matmul %22, %24, %cst_15 {dimension_numbers = #tpu.dot_dimension_numbers<[1], [0], [0], [1], [0, 0, 1, 1], [], []>} : vector<64x4xf32>, vector<4x128xf32>, vector<64x128xf32> -> vector<64x128xf32>
    %26 = arith.addf %20, %25 : vector<64x128xf32>
    %27 = vector.extract_strided_slice %1 {offsets = [1, 1, 0], sizes = [4, 16, 4], strides = [1, 1, 1]} : vector<6x18x4xf32> to vector<4x16x4xf32>
    %28 = vector.shape_cast %27 : vector<4x16x4xf32> to vector<64x4xf32>
    %c4 = arith.constant 4 : index
    %c0_16 = arith.constant 0 : index
    %c0_17 = arith.constant 0 : index
    %29 = vector.load %arg3[%c4, %c0_16, %c0_17] : memref<9x4x128xf32, #tpu.memory_space<vmem>>, vector<1x4x128xf32>
    %30 = vector.shape_cast %29 : vector<1x4x128xf32> to vector<4x128xf32>
    %cst_18 = arith.constant dense<0.000000e+00> : vector<64x128xf32>
    %31 = tpu.matmul %28, %30, %cst_18 {dimension_numbers = #tpu.dot_dimension_numbers<[1], [0], [0], [1], [0, 0, 1, 1], [], []>} : vector<64x4xf32>, vector<4x128xf32>, vector<64x128xf32> -> vector<64x128xf32>
    %32 = arith.addf %26, %31 : vector<64x128xf32>
    %33 = vector.extract_strided_slice %1 {offsets = [1, 2, 0], sizes = [4, 16, 4], strides = [1, 1, 1]} : vector<6x18x4xf32> to vector<4x16x4xf32>
    %34 = vector.shape_cast %33 : vector<4x16x4xf32> to vector<64x4xf32>
    %c5 = arith.constant 5 : index
    %c0_19 = arith.constant 0 : index
    %c0_20 = arith.constant 0 : index
    %35 = vector.load %arg3[%c5, %c0_19, %c0_20] : memref<9x4x128xf32, #tpu.memory_space<vmem>>, vector<1x4x128xf32>
    %36 = vector.shape_cast %35 : vector<1x4x128xf32> to vector<4x128xf32>
    %cst_21 = arith.constant dense<0.000000e+00> : vector<64x128xf32>
    %37 = tpu.matmul %34, %36, %cst_21 {dimension_numbers = #tpu.dot_dimension_numbers<[1], [0], [0], [1], [0, 0, 1, 1], [], []>} : vector<64x4xf32>, vector<4x128xf32>, vector<64x128xf32> -> vector<64x128xf32>
    %38 = arith.addf %32, %37 : vector<64x128xf32>
    %39 = vector.extract_strided_slice %1 {offsets = [2, 0, 0], sizes = [4, 16, 4], strides = [1, 1, 1]} : vector<6x18x4xf32> to vector<4x16x4xf32>
    %40 = vector.shape_cast %39 : vector<4x16x4xf32> to vector<64x4xf32>
    %c6 = arith.constant 6 : index
    %c0_22 = arith.constant 0 : index
    %c0_23 = arith.constant 0 : index
    %41 = vector.load %arg3[%c6, %c0_22, %c0_23] : memref<9x4x128xf32, #tpu.memory_space<vmem>>, vector<1x4x128xf32>
    %42 = vector.shape_cast %41 : vector<1x4x128xf32> to vector<4x128xf32>
    %cst_24 = arith.constant dense<0.000000e+00> : vector<64x128xf32>
    %43 = tpu.matmul %40, %42, %cst_24 {dimension_numbers = #tpu.dot_dimension_numbers<[1], [0], [0], [1], [0, 0, 1, 1], [], []>} : vector<64x4xf32>, vector<4x128xf32>, vector<64x128xf32> -> vector<64x128xf32>
    %44 = arith.addf %38, %43 : vector<64x128xf32>
    %45 = vector.extract_strided_slice %1 {offsets = [2, 1, 0], sizes = [4, 16, 4], strides = [1, 1, 1]} : vector<6x18x4xf32> to vector<4x16x4xf32>
    %46 = vector.shape_cast %45 : vector<4x16x4xf32> to vector<64x4xf32>
    %c7 = arith.constant 7 : index
    %c0_25 = arith.constant 0 : index
    %c0_26 = arith.constant 0 : index
    %47 = vector.load %arg3[%c7, %c0_25, %c0_26] : memref<9x4x128xf32, #tpu.memory_space<vmem>>, vector<1x4x128xf32>
    %48 = vector.shape_cast %47 : vector<1x4x128xf32> to vector<4x128xf32>
    %cst_27 = arith.constant dense<0.000000e+00> : vector<64x128xf32>
    %49 = tpu.matmul %46, %48, %cst_27 {dimension_numbers = #tpu.dot_dimension_numbers<[1], [0], [0], [1], [0, 0, 1, 1], [], []>} : vector<64x4xf32>, vector<4x128xf32>, vector<64x128xf32> -> vector<64x128xf32>
    %50 = arith.addf %44, %49 : vector<64x128xf32>
    %51 = vector.extract_strided_slice %1 {offsets = [2, 2, 0], sizes = [4, 16, 4], strides = [1, 1, 1]} : vector<6x18x4xf32> to vector<4x16x4xf32>
    %52 = vector.shape_cast %51 : vector<4x16x4xf32> to vector<64x4xf32>
    %c8 = arith.constant 8 : index
    %c0_28 = arith.constant 0 : index
    %c0_29 = arith.constant 0 : index
    %53 = vector.load %arg3[%c8, %c0_28, %c0_29] : memref<9x4x128xf32, #tpu.memory_space<vmem>>, vector<1x4x128xf32>
    %54 = vector.shape_cast %53 : vector<1x4x128xf32> to vector<4x128xf32>
    %cst_30 = arith.constant dense<0.000000e+00> : vector<64x128xf32>
    %55 = tpu.matmul %52, %54, %cst_30 {dimension_numbers = #tpu.dot_dimension_numbers<[1], [0], [0], [1], [0, 0, 1, 1], [], []>} : vector<64x4xf32>, vector<4x128xf32>, vector<64x128xf32> -> vector<64x128xf32>
    %56 = arith.addf %50, %55 : vector<64x128xf32>
    %c0_31 = arith.constant 0 : index
    %c0_32 = arith.constant 0 : index
    %57 = vector.load %arg4[%c0_31, %c0_32] : memref<1x128xf32, #tpu.memory_space<vmem>>, vector<1x128xf32>
    %58 = vector.broadcast %57 : vector<1x128xf32> to vector<64x128xf32>
    %59 = arith.addf %56, %58 : vector<64x128xf32>
    %cst_33 = arith.constant 0.000000e+00 : f32
    %60 = vector.broadcast %cst_33 : f32 to vector<64x128xf32>
    %61 = arith.maximumf %59, %60 : vector<64x128xf32>
    %c0_34 = arith.constant 0 : index
    %c0_35 = arith.constant 0 : index
    %c0_36 = arith.constant 0 : index
    %62 = vector.load %arg5[%c0_34, %c0_35, %c0_36] : memref<1x64x128xf32, #tpu.memory_space<vmem>>, vector<1x64x128xf32>
    %63 = vector.shape_cast %62 : vector<1x64x128xf32> to vector<64x128xf32>
    %64 = vector.shape_cast %61 : vector<64x128xf32> to vector<1x64x128xf32>
    tpu.vector_store %arg5[%c0_34, %c0_35, %c0_36], %64 {strides = array<i32>} : memref<1x64x128xf32, #tpu.memory_space<vmem>>, vector<1x64x128xf32>,
    return
  }
  func.func @transform_0(%arg0: i32, %arg1: i32) -> (i32, i32, i32, i32) {
    %c0_i32 = arith.constant 0 : i32
    %c0_i32_0 = arith.constant 0 : i32
    %c0_i32_1 = arith.constant 0 : i32
    %c0_i32_2 = arith.constant 0 : i32
    return %arg1, %c0_i32, %c0_i32_0, %c0_i32_1 : i32, i32, i32, i32
  }
  func.func @transform_1(%arg0: i32, %arg1: i32) -> (i32, i32, i32) {
    %c0_i32 = arith.constant 0 : i32
    %c0_i32_0 = arith.constant 0 : i32
    %c0_i32_1 = arith.constant 0 : i32
    return %c0_i32, %c0_i32_0, %arg0 : i32, i32, i32
  }
  func.func @transform_2(%arg0: i32, %arg1: i32) -> (i32, i32) {
    %c0_i32 = arith.constant 0 : i32
    %c0_i32_0 = arith.constant 0 : i32
    return %c0_i32, %arg0 : i32, i32
  }
  func.func @transform_3(%arg0: i32, %arg1: i32) -> (i32, i32, i32) {
    %c0_i32 = arith.constant 0 : i32
    %c0_i32_0 = arith.constant 0 : i32
    return %arg1, %c0_i32, %arg0 : i32, i32, i32
  }
}

module attributes {stable_mosaic.version = 11 : i64} {
  func.func @kernel(%arg0: i32, %arg1: i32, %arg2: memref<1x6x18x4xf32, #tpu.memory_space<vmem>>, %arg3: memref<9x4x128xf32, #tpu.memory_space<vmem>>, %arg4: memref<1x128xf32, #tpu.memory_space<vmem>>, %arg5: memref<1x64x128xf32, #tpu.memory_space<vmem>>) attributes {dimension_semantics = [#tpu.dimension_semantics<parallel>, #tpu.dimension_semantics<parallel>], iteration_bounds = array<i64: 1, 8>, scalar_prefetch = 0 : i64, scratch_operands = 0 : i64, tpu.core_type = #tpu.core_type<tc>, window_params = [{transform_indices = @transform_0, window_bounds = array<i64: 1, 6, 18, 4>}, {transform_indices = @transform_1, window_bounds = array<i64: 9, 4, 128>}, {transform_indices = @transform_2, window_bounds = array<i64: 1, 128>}, {transform_indices = @transform_3, window_bounds = array<i64: 1, 64, 128>}]} {
    %c0 = arith.constant 0 : index
    %c0_0 = arith.constant 0 : index
    %c0_1 = arith.constant 0 : index
    %c0_2 = arith.constant 0 : index
    %0 = vector.load %arg2[%c0, %c0_0, %c0_1, %c0_2] : memref<1x6x18x4xf32, #tpu.memory_space<vmem>>, vector<1x6x18x4xf32>
    %1 = vector.shape_cast %0 : vector<1x6x18x4xf32> to vector<6x18x4xf32>
    %cst = arith.constant 0.000000e+00 : f32
    %2 = vector.broadcast %cst : f32 to vector<64x128xf32>
    %3 = vector.extract_strided_slice %1 {offsets = [0, 0, 0], sizes = [4, 16, 4], strides = [1, 1, 1]} : vector<6x18x4xf32> to vector<4x16x4xf32>
    %4 = vector.shape_cast %3 : vector<4x16x4xf32> to vector<64x4xf32>
    %c0_3 = arith.constant 0 : index
    %c0_4 = arith.constant 0 : index
    %c0_5 = arith.constant 0 : index
    %5 = vector.load %arg3[%c0_3, %c0_4, %c0_5] : memref<9x4x128xf32, #tpu.memory_space<vmem>>, vector<1x4x128xf32>
    %6 = vector.shape_cast %5 : vector<1x4x128xf32> to vector<4x128xf32>
    %cst_6 = arith.constant dense<0.000000e+00> : vector<64x128xf32>
    %7 = tpu.matmul %4, %6, %cst_6 {dimension_numbers = #tpu.dot_dimension_numbers<[1], [0], [0], [1], [0, 0, 1, 1], [], []>} : vector<64x4xf32>, vector<4x128xf32>, vector<64x128xf32> -> vector<64x128xf32>
    %8 = arith.addf %2, %7 : vector<64x128xf32>
    %9 = vector.extract_strided_slice %1 {offsets = [0, 1, 0], sizes = [4, 16, 4], strides = [1, 1, 1]} : vector<6x18x4xf32> to vector<4x16x4xf32>
    %10 = vector.shape_cast %9 : vector<4x16x4xf32> to vector<64x4xf32>
    %c1 = arith.constant 1 : index
    %c0_7 = arith.constant 0 : index
    %c0_8 = arith.constant 0 : index
    %11 = vector.load %arg3[%c1, %c0_7, %c0_8] : memref<9x4x128xf32, #tpu.memory_space<vmem>>, vector<1x4x128xf32>
    %12 = vector.shape_cast %11 : vector<1x4x128xf32> to vector<4x128xf32>
    %cst_9 = arith.constant dense<0.000000e+00> : vector<64x128xf32>
    %13 = tpu.matmul %10, %12, %cst_9 {dimension_numbers = #tpu.dot_dimension_numbers<[1], [0], [0], [1], [0, 0, 1, 1], [], []>} : vector<64x4xf32>, vector<4x128xf32>, vector<64x128xf32> -> vector<64x128xf32>
    %14 = arith.addf %8, %13 : vector<64x128xf32>
    %15 = vector.extract_strided_slice %1 {offsets = [0, 2, 0], sizes = [4, 16, 4], strides = [1, 1, 1]} : vector<6x18x4xf32> to vector<4x16x4xf32>
    %16 = vector.shape_cast %15 : vector<4x16x4xf32> to vector<64x4xf32>
    %c2 = arith.constant 2 : index
    %c0_10 = arith.constant 0 : index
    %c0_11 = arith.constant 0 : index
    %17 = vector.load %arg3[%c2, %c0_10, %c0_11] : memref<9x4x128xf32, #tpu.memory_space<vmem>>, vector<1x4x128xf32>
    %18 = vector.shape_cast %17 : vector<1x4x128xf32> to vector<4x128xf32>
    %cst_12 = arith.constant dense<0.000000e+00> : vector<64x128xf32>
    %19 = tpu.matmul %16, %18, %cst_12 {dimension_numbers = #tpu.dot_dimension_numbers<[1], [0], [0], [1], [0, 0, 1, 1], [], []>} : vector<64x4xf32>, vector<4x128xf32>, vector<64x128xf32> -> vector<64x128xf32>
    %20 = arith.addf %14, %19 : vector<64x128xf32>
    %21 = vector.extract_strided_slice %1 {offsets = [1, 0, 0], sizes = [4, 16, 4], strides = [1, 1, 1]} : vector<6x18x4xf32> to vector<4x16x4xf32>
    %22 = vector.shape_cast %21 : vector<4x16x4xf32> to vector<64x4xf32>
    %c3 = arith.constant 3 : index
    %c0_13 = arith.constant 0 : index
    %c0_14 = arith.constant 0 : index
    %23 = vector.load %arg3[%c3, %c0_13, %c0_14] : memref<9x4x128xf32, #tpu.memory_space<vmem>>, vector<1x4x128xf32>
    %24 = vector.shape_cast %23 : vector<1x4x128xf32> to vector<4x128xf32>
    %cst_15 = arith.constant dense<0.000000e+00> : vector<64x128xf32>
    %25 = tpu.matmul %22, %24, %cst_15 {dimension_numbers = #tpu.dot_dimension_numbers<[1], [0], [0], [1], [0, 0, 1, 1], [], []>} : vector<64x4xf32>, vector<4x128xf32>, vector<64x128xf32> -> vector<64x128xf32>
    %26 = arith.addf %20, %25 : vector<64x128xf32>
    %27 = vector.extract_strided_slice %1 {offsets = [1, 1, 0], sizes = [4, 16, 4], strides = [1, 1, 1]} : vector<6x18x4xf32> to vector<4x16x4xf32>
    %28 = vector.shape_cast %27 : vector<4x16x4xf32> to vector<64x4xf32>
    %c4 = arith.constant 4 : index
    %c0_16 = arith.constant 0 : index
    %c0_17 = arith.constant 0 : index
    %29 = vector.load %arg3[%c4, %c0_16, %c0_17] : memref<9x4x128xf32, #tpu.memory_space<vmem>>, vector<1x4x128xf32>
    %30 = vector.shape_cast %29 : vector<1x4x128xf32> to vector<4x128xf32>
    %cst_18 = arith.constant dense<0.000000e+00> : vector<64x128xf32>
    %31 = tpu.matmul %28, %30, %cst_18 {dimension_numbers = #tpu.dot_dimension_numbers<[1], [0], [0], [1], [0, 0, 1, 1], [], []>} : vector<64x4xf32>, vector<4x128xf32>, vector<64x128xf32> -> vector<64x128xf32>
    %32 = arith.addf %26, %31 : vector<64x128xf32>
    %33 = vector.extract_strided_slice %1 {offsets = [1, 2, 0], sizes = [4, 16, 4], strides = [1, 1, 1]} : vector<6x18x4xf32> to vector<4x16x4xf32>
    %34 = vector.shape_cast %33 : vector<4x16x4xf32> to vector<64x4xf32>
    %c5 = arith.constant 5 : index
    %c0_19 = arith.constant 0 : index
    %c0_20 = arith.constant 0 : index
    %35 = vector.load %arg3[%c5, %c0_19, %c0_20] : memref<9x4x128xf32, #tpu.memory_space<vmem>>, vector<1x4x128xf32>
    %36 = vector.shape_cast %35 : vector<1x4x128xf32> to vector<4x128xf32>
    %cst_21 = arith.constant dense<0.000000e+00> : vector<64x128xf32>
    %37 = tpu.matmul %34, %36, %cst_21 {dimension_numbers = #tpu.dot_dimension_numbers<[1], [0], [0], [1], [0, 0, 1, 1], [], []>} : vector<64x4xf32>, vector<4x128xf32>, vector<64x128xf32> -> vector<64x128xf32>
    %38 = arith.addf %32, %37 : vector<64x128xf32>
    %39 = vector.extract_strided_slice %1 {offsets = [2, 0, 0], sizes = [4, 16, 4], strides = [1, 1, 1]} : vector<6x18x4xf32> to vector<4x16x4xf32>
    %40 = vector.shape_cast %39 : vector<4x16x4xf32> to vector<64x4xf32>
    %c6 = arith.constant 6 : index
    %c0_22 = arith.constant 0 : index
    %c0_23 = arith.constant 0 : index
    %41 = vector.load %arg3[%c6, %c0_22, %c0_23] : memref<9x4x128xf32, #tpu.memory_space<vmem>>, vector<1x4x128xf32>
    %42 = vector.shape_cast %41 : vector<1x4x128xf32> to vector<4x128xf32>
    %cst_24 = arith.constant dense<0.000000e+00> : vector<64x128xf32>
    %43 = tpu.matmul %40, %42, %cst_24 {dimension_numbers = #tpu.dot_dimension_numbers<[1], [0], [0], [1], [0, 0, 1, 1], [], []>} : vector<64x4xf32>, vector<4x128xf32>, vector<64x128xf32> -> vector<64x128xf32>
    %44 = arith.addf %38, %43 : vector<64x128xf32>
    %45 = vector.extract_strided_slice %1 {offsets = [2, 1, 0], sizes = [4, 16, 4], strides = [1, 1, 1]} : vector<6x18x4xf32> to vector<4x16x4xf32>
    %46 = vector.shape_cast %45 : vector<4x16x4xf32> to vector<64x4xf32>
    %c7 = arith.constant 7 : index
    %c0_25 = arith.constant 0 : index
    %c0_26 = arith.constant 0 : index
    %47 = vector.load %arg3[%c7, %c0_25, %c0_26] : memref<9x4x128xf32, #tpu.memory_space<vmem>>, vector<1x4x128xf32>
    %48 = vector.shape_cast %47 : vector<1x4x128xf32> to vector<4x128xf32>
    %cst_27 = arith.constant dense<0.000000e+00> : vector<64x128xf32>
    %49 = tpu.matmul %46, %48, %cst_27 {dimension_numbers = #tpu.dot_dimension_numbers<[1], [0], [0], [1], [0, 0, 1, 1], [], []>} : vector<64x4xf32>, vector<4x128xf32>, vector<64x128xf32> -> vector<64x128xf32>
    %50 = arith.addf %44, %49 : vector<64x128xf32>
    %51 = vector.extract_strided_slice %1 {offsets = [2, 2, 0], sizes = [4, 16, 4], strides = [1, 1, 1]} : vector<6x18x4xf32> to vector<4x16x4xf32>
    %52 = vector.shape_cast %51 : vector<4x16x4xf32> to vector<64x4xf32>
    %c8 = arith.constant 8 : index
    %c0_28 = arith.constant 0 : index
    %c0_29 = arith.constant 0 : index
    %53 = vector.load %arg3[%c8, %c0_28, %c0_29] : memref<9x4x128xf32, #tpu.memory_space<vmem>>, vector<1x4x128xf32>
    %54 = vector.shape_cast %53 : vector<1x4x128xf32> to vector<4x128xf32>
    %cst_30 = arith.constant dense<0.000000e+00> : vector<64x128xf32>
    %55 = tpu.matmul %52, %54, %cst_30 {dimension_numbers = #tpu.dot_dimension_numbers<[1], [0], [0], [1], [0, 0, 1, 1], [], []>} : vector<64x4xf32>, vector<4x128xf32>, vector<64x128xf32> -> vector<64x128xf32>
    %56 = arith.addf %50, %55 : vector<64x128xf32>
    %c0_31 = arith.constant 0 : index
    %c0_32 = arith.constant 0 : index
    %57 = vector.load %arg4[%c0_31, %c0_32] : memref<1x128xf32, #tpu.memory_space<vmem>>, vector<1x128xf32>
    %58 = vector.broadcast %57 : vector<1x128xf32> to vector<64x128xf32>
    %59 = arith.addf %56, %58 : vector<64x128xf32>
    %cst_33 = arith.constant 0.000000e+00 : f32
    %60 = vector.broadcast %cst_33 : f32 to vector<64x128xf32>
    %61 = arith.maximumf %59, %60 : vector<64x128xf32>
    %c0_34 = arith.constant 0 : index
    %c0_35 = arith.constant 0 : index
    %c0_36 = arith.constant 0 : index
    %62 = vector.load %arg5[%c0_34, %c0_35, %c0_36] : memref<1x64x128xf32, #tpu.memory_space<vmem>>, vector<1x64x128xf32>
    %63 = vector.shape_cast %62 : vector<1x64x128xf32> to vector<64x128xf32>
    %64 = vector.shape_cast %61 : vector<64x128xf32> to vector<1x64x128xf32>
    tpu.vector_store %arg5[%c0_34, %c0_35, %c0_36], %64 {strides = array<i32>} : memref<1x64x128xf32, #tpu.memory_space<vmem>>, vector<1x64x128xf32>,
    return
  }
  func.func @transform_0(%arg0: i32, %arg1: i32) -> (i32, i32, i32, i32) {
    %c0_i32 = arith.constant 0 : i32
    %c0_i32_0 = arith.constant 0 : i32
    %c0_i32_1 = arith.constant 0 : i32
    %c0_i32_2 = arith.constant 0 : i32
    return %arg1, %c0_i32, %c0_i32_0, %c0_i32_1 : i32, i32, i32, i32
  }
  func.func @transform_1(%arg0: i32, %arg1: i32) -> (i32, i32, i32) {
    %c0_i32 = arith.constant 0 : i32
    %c0_i32_0 = arith.constant 0 : i32
    %c0_i32_1 = arith.constant 0 : i32
    return %c0_i32, %c0_i32_0, %arg0 : i32, i32, i32
  }
  func.func @transform_2(%arg0: i32, %arg1: i32) -> (i32, i32) {
    %c0_i32 = arith.constant 0 : i32
    %c0_i32_0 = arith.constant 0 : i32
    return %c0_i32, %arg0 : i32, i32
  }
  func.func @transform_3(%arg0: i32, %arg1: i32) -> (i32, i32, i32) {
    %c0_i32 = arith.constant 0 : i32
    %c0_i32_0 = arith.constant 0 : i32
    return %arg1, %c0_i32, %arg0 : i32, i32, i32
  }
}

</mosaic_0001>

<bundles_post_ra>
// kernel: tpu_custom_call.1
= control target key start
LH: loop header
LB: loop body
LE: loop exit
PB: predicated region body
PF: predicated region fallthrough
CT: control target
= control target key end

     0   :  { %8 = vsyncpa [#allocation3], 0  ;;  %s1684_s0 = inlined_call_operand.vmem [shape: f32[8,6,18,4], index: 0, kind: input, shape index: {}]   ;;  %s1685_s1 = inlined_call_operand.vmem [shape: f32[9,4,128], index: 1, kind: input, shape index: {}]   ;;  %s1686_s2 = inlined_call_operand.vmem [shape: f32[1,128], index: 2, kind: input, shape index: {}]   ;;  %s1687_s3 = inlined_call_operand.hbm [shape: f32[8,64,128], index: 3, kind: output, shape index: {}]  }
   0x1   :  { %10 = vsyncpa [#allocation3 + $0x1], 0  ;;  %s1267_s12 = smov 0   ;;  %s1269_s13 = smov 0  }
   0x2   :  { %s1271_s14 = smov 0   ;;  %s1273_s15 = smov 0  }
   0x3   :  { %s1275_s16 = smov 0   ;;  %s1277_s17 = smov 0  }
   0x4 LB: > { %s999_s18 = sadd.s32 4294967295, %s1243_s17   ;;  %s1000_s19 = sadd.s32 4294967294, %s1243_s17   ;;  %s1243_s17 = sphi %s1277_s17, %s16_s17   ;;  %s1239_s16 = sphi %s1275_s16, %s1694_s16   ;;  %s1235_s15 = sphi %s1273_s15, %s1693_s15   ;;  %s1231_s14 = sphi %s1271_s14, %s1692_s14   ;;  %s1227_s13 = sphi %s1269_s13, %s1691_s13   ;;  %s1223_s12 = sphi %s1267_s12, %s1690_s12  }
   0x5   : > { %s25_s20 = sadd.s32 1, %s1239_s16  ;;  %s115_s21 = sadd.s32 1, %s1231_s14 }
   0x6   : > { %p26_p0 = scmp.ge.s32.totalorder %s25_s20, 8  ;;  %p125_p1 = scmp.ne.s32.totalorder %s1231_s14, %s1227_s13 }
   0x7   : > { %p126_p2 = scmp.eq.s32.totalorder %s999_s18, 7  ;;  %p131_p3 = scmp.ne.s32.totalorder %s1227_s13, %s1223_s12 }
   0x8   : > { %s1696_s20 = smov (%p26_p0, %s25_s20), 0  ;;  %p132_p5 = scmp.eq.s32.totalorder %s1000_s19, 7 }
   0x9   : > { %p1307_p4 = por %p126_p2, %p125_p1  ;;  %s110_s23 = ssub.s32 %s1239_s16, %s1696_s20 }
   0xa   : > { %p1005_p6 = scmp.ge.s32.totalorder %s1243_s17, 1  ;;  %p113_p7 = scmp.eq.s32.totalorder %s110_s23, 0 }
   0xb   : > { %p1314_p8 = por %p132_p5, %p131_p3  ;;  %p171_p9 = scmp.lt.s32.totalorder %s1243_s17, 9 }
   0xc   : > { %s1320_s25 = scalar_select %p113_p7, %s1231_s14, %s115_s21  }
   0xd   : > { %p172_p10 = pnand %p1005_p6, %p171_p9 }
   0xe   : > { %p202_p11 = scmp.lt.s32.totalorder (!%p172_p10), %s1235_s15, 7  ;;  %s199_s5 = sand.u32 (!%p172_p10), 1, %s1227_s13  }
   0xf   : > { %175 = sbr.rel (%p172_p10) target bundleno = 312 (0x138), region = 32  ;;  %s1006_s8 = sshll.u32 (!%p172_p10), %s199_s5, 6 }
  0x10   : > { %s1607_s9 = scalar_lea.vmem (!%p172_p10), [#allocation2], %s1006_s8  ;;  %s1185_s30 = scalar_lea.hbm (!%p172_p10), %s1687_s3, 512 }
  0x11   : > { %s897_s21 = sshll.u32 (!%p172_p10), %s1607_s9, 4  ;;  %s898_s21 = int_to_ptr.vmem [resolvable:$true] %s897_s21 }
  0x14   : > { %v1008_v0 = vld [vmem:[%s1685_s1 + $0x4] sm:$0xf]  ;;  %vm285_vm0 = vcmask 1043456   ;;  %v1027_v1 = vld [vmem:[%s1685_s1 + $0x8] sm:$0xf]  ;;  %s203_s7 = scalar_select %p202_p11, %s1235_s15, 7 }
  0x15   : > { %1103 = vmatpush.msk.msra.mxu1 %vm285_vm0, %v1008_v0  ;;  %1104 = vmatpush.msk.msra.mxu2 %vm285_vm0, %v1008_v0  ;;  %v1037_v2 = vld [vmem:[%s1685_s1 + $0xc] sm:$0xf]  ;;  %v232_v3 = vld [vmem:[%s1685_s1] sm:$0xf]  ;;  %v1047_v4 = vld [vmem:[%s1685_s1 + $0x10] sm:$0xf] }
  0x16   : > { %1105 = vmatpush.msk.msra.mxu3 %vm285_vm0, %v1008_v0  ;;  %s1106_s10 = smul.u32 144, %s203_s7  ;;  %1009 = vmatpush.msk.msra.mxu0 %vm285_vm0, %v1008_v0  ;;  %vm245_vm1 = vcmask 1046528   ;;  %vm268_vm2 = vcmask 31744   ;;  %v1067_v14 = vld [vmem:[%s1685_s1 + $0x18] sm:$0xf]  ;;  %vm390_vm3 = vcmask 1045504  }
  0x17   : > { %1028 = vmatpush.msk.msrb.mxu2 %vm285_vm0, %v1027_v1  ;;  %1018 = vmatpush.msk.msrb.mxu1 %vm285_vm0, %v232_v3  ;;  %v1077_v24 = vld [vmem:[%s1685_s1 + $0x1c] sm:$0xf]  ;;  %v1057_v29 = vld [vmem:[%s1685_s1 + $0x14] sm:$0xf]  ;;  %v1087_v32 = vld [vmem:[%s1685_s1 + $0x20] sm:$0xf] }
  0x18   : > { %1038 = vmatpush.msk.msrb.mxu3 %vm285_vm0, %v1037_v2  ;;  %1048 = vmatpush.msk.msrb.mxu0 %vm285_vm0, %v1047_v4  ;;  %s1350_s19 = scalar_lea.vmem %s1684_s0, %s1106_s10  ;;  %s1102_s10 = sshll.u32 %s1235_s15, 6 }
  0x19   : > { %v1353_v5 = vld [vmem:[%s1350_s19 + $0x18] sm:$0xff]  ;;  %v1356_v6 = vld [vmem:[%s1350_s19 + $0x20] sm:$0xff]  ;;  %v1359_v7 = vld [vmem:[%s1350_s19 + $0x30] sm:$0xff]  ;;  %s884_s15 = scalar_lea.sflag [#allocation3], %s199_s5 }
  0x1a   : > { %v251_v8 = vrot.slane %v1353_v5, 1  ;;  %v252_v9 = vrot.slane %v1356_v6, 1  ;;  %v1364_v10 = vld [vmem:[%s1350_s19 + $0x38] sm:$0xff]  ;;  %v256_v11 = vrot.slane %v1359_v7, 1  ;;  %v1368_v12 = vld [vmem:[%s1350_s19 + $0x48] sm:$0xff]  ;;  %v1371_v13 = vld [vmem:[%s1350_s19 + $0x50] sm:$0xff] }
  0x1b   : > { %v257_v15 = vrot.slane %v1364_v10, 1  ;;  %v261_v16 = vrot.slane %v1368_v12, 1  ;;  %v262_v17 = vrot.slane %v1371_v13, 1  ;;  %v219_v18 = vld [vmem:[%s1350_s19 + $0x28] sm:$0x3]  ;;  %v214_v19 = vld [vmem:[%s1350_s19] sm:$0xff] }
  0x1c   : > { %v253_v20 = vsel %vm245_vm1, %v251_v8, %v252_v9  ;;  %v1383_v21 = vld [vmem:[%s1350_s19 + $0x40] sm:$0x3]  ;;  %v215_v22 = vld [vmem:[%s1350_s19 + $0x8] sm:$0xff]  ;;  %v246_v23 = vrot.slane %v214_v19, 1  ;;  %v1397_v28 = vld [vmem:[%s1350_s19 + $0x58] sm:$0x3] }
  0x1d   : > { %1012 = vmatmul.msk.f32.vlgmr.msra.gmra.mxu1 %vm268_vm2, %v253_v20  ;;  %v1391_v25 = vsel %vm245_vm1, %v256_v11, %v257_v15  ;;  %v1394_v26 = vsel %vm245_vm1, %v261_v16, %v262_v17  ;;  %v247_v27 = vrot.slane %v215_v22, 1  ;;  %v254_v30 = vrot.slane %v219_v18, 1  ;;  %v216_v31 = vld [vmem:[%s1350_s19 + $0x10] sm:$0x3]  ;;  %v227_v56 = vld [vmem:[%s1350_s19 + $0x68] sm:$0xff]  ;;  %v226_v59 = vld [vmem:[%s1350_s19 + $0x60] sm:$0xff] }
  0x1e   : > { %1014 = vmatmul.msk.f32.vlgmr.msra.gmra.mxu2 %vm268_vm2, %v1391_v25  ;;  %1016 = vmatmul.msk.f32.vlgmr.msra.gmra.mxu3 %vm268_vm2, %v1394_v26  ;;  %v259_v33 = vrot.slane %v1383_v21, 1  ;;  %v264_v35 = vrot.slane %v1397_v28, 1  ;;  %v249_v36 = vrot.slane %v216_v31, 1  ;;  %v391_v41 = vrot.slane %v214_v19, 2  ;;  %v228_v0 = vld [vmem:[%s1350_s19 + $0x70] sm:$0x3] }
  0x1f   : > { %v248_v34 = vsel %vm245_vm1, %v246_v23, %v247_v27  ;;  %1068 = vmatpush.msk.msra.mxu2 %vm285_vm0, %v1067_v14  ;;  %1078 = vmatpush.msk.msra.mxu3 %vm285_vm0, %v1077_v24  ;;  %v255_v37 = vsel %vm245_vm1, %v252_v9, %v254_v30  ;;  %v392_v42 = vrot.slane %v215_v22, 2  ;;  %v394_v44 = vrot.slane %v216_v31, 2  ;;  %v229_v9 = vld [vmem:[%s1350_s19 + $0x78] sm:$0xff] }
  0x20   : > { %1010 = vmatmul.msk.f32.vlgmr.msra.gmra.mxu0 %vm268_vm2, %v248_v34  ;;  %1058 = vmatpush.msk.msra.mxu1 %vm285_vm0, %v1057_v29  ;;  %v1420_v38 = vsel %vm245_vm1, %v257_v15, %v259_v33  ;;  %v1423_v39 = vsel %vm245_vm1, %v262_v17, %v264_v35  ;;  %v250_v40 = vsel %vm245_vm1, %v247_v27, %v249_v36  ;;  %v396_v46 = vrot.slane %v1353_v5, 2 }
  0x21   : > { %1088 = vmatpush.msk.msra.mxu0 %vm285_vm0, %v1087_v32  ;;  %v393_v43 = vsel %vm390_vm3, %v391_v41, %v392_v42  ;;  %v395_v45 = vsel %vm390_vm3, %v392_v42, %v394_v44  ;;  %v397_v47 = vrot.slane %v1356_v6, 2  ;;  %v399_v49 = vrot.slane %v219_v18, 2  ;;  %v231_v18 = vld [vmem:[%s1350_s19 + $0x88] sm:$0x3] }
  0x22   : > { %v401_v51 = vrot.slane %v1359_v7, 2  ;;  %v402_v52 = vrot.slane %v1364_v10, 2  ;;  %v404_v54 = vrot.slane %v1383_v21, 2  ;;  %v406_v57 = vrot.slane %v1368_v12, 2 }
  0x23   : > { %v398_v48 = vsel %vm390_vm3, %v396_v46, %v397_v47  ;;  %v400_v50 = vsel %vm390_vm3, %v397_v47, %v399_v49  ;;  %v407_v58 = vrot.slane %v1371_v13, 2  ;;  %v542_v60 = vrot.slane %v226_v59, 1 }
  0x24   : > { %v403_v53 = vsel %vm390_vm3, %v401_v51, %v402_v52  ;;  %v405_v55 = vsel %vm390_vm3, %v402_v52, %v404_v54  ;;  %v543_v61 = vrot.slane %v227_v56, 1  ;;  %v409_v1 = vrot.slane %v1397_v28, 2 }
  0x25   : > { %1013 = vmatmul.msk.f32.gmra.mxu1 %vm268_vm2, %v255_v37  ;;  %v408_v62 = vsel %vm390_vm3, %v406_v57, %v407_v58  ;;  %v545_v2 = vrot.slane %v228_v0, 1  ;;  %v608_v8 = vrot.slane %v228_v0, 2  ;;  %v792_v14 = vrot.slane %v229_v9, 2 }
  0x26   : > { %1015 = vmatmul.msk.f32.gmra.mxu2 %vm268_vm2, %v1420_v38  ;;  %1017 = vmatmul.msk.f32.gmra.mxu3 %vm268_vm2, %v1423_v39  ;;  %v544_v63 = vsel %vm245_vm1, %v542_v60, %v543_v61  ;;  %v410_v3 = vsel %vm390_vm3, %v407_v58, %v409_v1  ;;  %v732_v21 = vrot.slane %v231_v18, 1  ;;  %v795_v24 = vrot.slane %v231_v18, 2 }
  0x27   : > { %v546_v4 = vsel %vm245_vm1, %v543_v61, %v545_v2 }
  0x28   : > { %1011 = vmatmul.msk.f32.gmra.mxu0 %vm268_vm2, %v250_v40 }
  0x2d   : > { %1019 = vmatmul.msk.f32.vlgmr.msrb.gmra.mxu1 %vm268_vm2, %v214_v19 }
  0x2e   : > { %1029 = vmatmul.msk.f32.vlgmr.msrb.gmra.mxu2 %vm268_vm2, %v393_v43  ;;  %1039 = vmatmul.msk.f32.vlgmr.msrb.gmra.mxu3 %vm268_vm2, %v1353_v5 }
  0x30   : > { %1049 = vmatmul.msk.f32.vlgmr.msrb.gmra.mxu0 %vm268_vm2, %v253_v20 }
  0x35   : > { %1020 = vmatmul.msk.f32.gmra.mxu1 %vm268_vm2, %v215_v22 }
  0x36   : > { %1030 = vmatmul.msk.f32.gmra.mxu2 %vm268_vm2, %v395_v45  ;;  %1040 = vmatmul.msk.f32.gmra.mxu3 %vm268_vm2, %v1356_v6 }
  0x38   : > { %1050 = vmatmul.msk.f32.gmra.mxu0 %vm268_vm2, %v255_v37 }
  0x3d   : > { %1021 = vmatmul.msk.f32.gmra.mxu1 %vm268_vm2, %v1353_v5  ;;  %v605_v5 = vrot.slane %v226_v59, 2 }
  0x3e   : > { %1031 = vmatmul.msk.f32.gmra.mxu2 %vm268_vm2, %v398_v48  ;;  %1041 = vmatmul.msk.f32.gmra.mxu3 %vm268_vm2, %v1359_v7 }
  0x40   : > { %1051 = vmatmul.msk.f32.gmra.mxu0 %vm268_vm2, %v1391_v25 }
  0x45   : > { %1022 = vmatmul.msk.f32.gmra.mxu1 %vm268_vm2, %v1356_v6  ;;  %v606_v6 = vrot.slane %v227_v56, 2 }
  0x46   : > { %1032 = vmatmul.msk.f32.gmra.mxu2 %vm268_vm2, %v400_v50  ;;  %1042 = vmatmul.msk.f32.gmra.mxu3 %vm268_vm2, %v1364_v10 }
  0x47   : > { %v609_v11 = vsel %vm390_vm3, %v606_v6, %v608_v8 }
  0x48   : > { %1052 = vmatmul.msk.f32.gmra.mxu0 %vm268_vm2, %v1420_v38 }
  0x4d   : > { %1023 = vmatmul.msk.f32.gmra.mxu1 %vm268_vm2, %v1359_v7 }
  0x4e   : > { %1033 = vmatmul.msk.f32.gmra.mxu2 %vm268_vm2, %v403_v53  ;;  %1043 = vmatmul.msk.f32.gmra.mxu3 %vm268_vm2, %v1368_v12 }
  0x50   : > { %1053 = vmatmul.msk.f32.gmra.mxu0 %vm268_vm2, %v1394_v26 }
  0x55   : > { %1024 = vmatmul.msk.f32.gmra.mxu1 %vm268_vm2, %v1364_v10 }
  0x56   : > { %1034 = vmatmul.msk.f32.gmra.mxu2 %vm268_vm2, %v405_v55  ;;  %1044 = vmatmul.msk.f32.gmra.mxu3 %vm268_vm2, %v1371_v13 }
  0x58   : > { %1054 = vmatmul.msk.f32.gmra.mxu0 %vm268_vm2, %v1423_v39 }
  0x5d   : > { %1025 = vmatmul.msk.f32.gmra.mxu1 %vm268_vm2, %v1368_v12 }
  0x5e   : > { %1035 = vmatmul.msk.f32.gmra.mxu2 %vm268_vm2, %v408_v62  ;;  %1045 = vmatmul.msk.f32.gmra.mxu3 %vm268_vm2, %v226_v59 }
  0x60   : > { %1055 = vmatmul.msk.f32.gmra.mxu0 %vm268_vm2, %v544_v63 }
  0x65   : > { %1026 = vmatmul.msk.f32.gmra.mxu1 %vm268_vm2, %v1371_v13 }
  0x66   : > { %1036 = vmatmul.msk.f32.gmra.mxu2 %vm268_vm2, %v410_v3  ;;  %1046 = vmatmul.msk.f32.gmra.mxu3 %vm268_vm2, %v227_v56 }
  0x68   : > { %1056 = vmatmul.msk.f32.gmra.mxu0 %vm268_vm2, %v546_v4 }
  0x6d   : > { %1059 = vmatmul.msk.f32.vlgmr.msra.gmra.mxu1 %vm268_vm2, %v398_v48 }
  0x6e   : > { %1069 = vmatmul.msk.f32.vlgmr.msra.gmra.mxu2 %vm268_vm2, %v1359_v7  ;;  %1079 = vmatmul.msk.f32.vlgmr.msra.gmra.mxu3 %vm268_vm2, %v1391_v25  ;;  %v607_v7 = vsel %vm390_vm3, %v605_v5, %v606_v6 }
  0x70   : > { %1089 = vmatmul.msk.f32.vlgmr.msra.gmra.mxu0 %vm268_vm2, %v403_v53 }
  0x75   : > { %1060 = vmatmul.msk.f32.gmra.mxu1 %vm268_vm2, %v400_v50 }
  0x76   : > { %1070 = vmatmul.msk.f32.gmra.mxu2 %vm268_vm2, %v1364_v10  ;;  %1080 = vmatmul.msk.f32.gmra.mxu3 %vm268_vm2, %v1420_v38  ;;  %v230_v10 = vld [vmem:[%s1350_s19 + $0x80] sm:$0xff]  ;;  %s896_s19 = scalar_lea.hbm %s1687_s3, %s1102_s10 }
  0x77   : > { %v793_v15 = vrot.slane %v230_v10, 2  ;;  %s899_s23 = sshll.u32 %s896_s19, 4  ;;  %s900_s23 = int_to_ptr.hbm [resolvable:$true] %s899_s23 }
  0x78   : > { %1090 = vmatmul.msk.f32.gmra.mxu0 %vm268_vm2, %v405_v55  ;;  %s1179_s26 = sshra.s32 %s900_s23, 4  ;;  %s1180_s26 = int_to_ptr.hbm [resolvable:$true] %s1179_s26 }
  0x79   : > { %v794_v20 = vsel %vm390_vm3, %v792_v14, %v793_v15  ;;  %v796_v28 = vsel %vm390_vm3, %v793_v15, %v795_v24  ;;  %v1601_v15 = vld [vmem:[%s1686_s2] ss:$0 sm:$0xff]  ;;  %s1181_s27 = scalar_lea.hbm %s1180_s26, 64  ;;  %p1186_p1 = scmp.lt.s32.totalorder %s1180_s26, %s1687_s3 }
  0x7a   : > { %p1182_p12 = scmp.ne.s32.totalorder %s1180_s26, %s1181_s27  ;;  %p1187_p2 = scmp.lt.s32.totalorder %s1185_s30, %s1181_s27 }
  0x7c   : > { %p1183_p13 = pnand %p1182_p12, %p1307_p4  ;;  %p1188_p3 = por %p1187_p2, %p1186_p1 }
  0x7d   : > { %1061 = vmatmul.msk.f32.gmra.mxu1 %vm268_vm2, %v403_v53 }
  0x7e   : > { %1071 = vmatmul.msk.f32.gmra.mxu2 %vm268_vm2, %v1368_v12  ;;  %1081 = vmatmul.msk.f32.gmra.mxu3 %vm268_vm2, %v1394_v26  ;;  %v729_v12 = vrot.slane %v229_v9, 1  ;;  %p1184_p0 = pneg %p1183_p13 }
  0x80   : > { %1091 = vmatmul.msk.f32.gmra.mxu0 %vm268_vm2, %v408_v62  ;;  %p1189_p5 = pnand %p1188_p3, %p1184_p0 }
  0x85   : > { %1062 = vmatmul.msk.f32.gmra.mxu1 %vm268_vm2, %v405_v55 }
  0x86   : > { %1072 = vmatmul.msk.f32.gmra.mxu2 %vm268_vm2, %v1371_v13  ;;  %1082 = vmatmul.msk.f32.gmra.mxu3 %vm268_vm2, %v1423_v39  ;;  %v730_v13 = vrot.slane %v230_v10, 1 }
  0x88   : > { %1092 = vmatmul.msk.f32.gmra.mxu0 %vm268_vm2, %v410_v3  ;;  %v731_v17 = vsel %vm245_vm1, %v729_v12, %v730_v13  ;;  %v733_v26 = vsel %vm245_vm1, %v730_v13, %v732_v21 }
  0x8d   : > { %1063 = vmatmul.msk.f32.gmra.mxu1 %vm268_vm2, %v408_v62 }
  0x8e   : > { %1073 = vmatmul.msk.f32.gmra.mxu2 %vm268_vm2, %v226_v59  ;;  %1083 = vmatmul.msk.f32.gmra.mxu3 %vm268_vm2, %v544_v63 }
  0x90   : > { %1093 = vmatmul.msk.f32.gmra.mxu0 %vm268_vm2, %v607_v7 }
  0x95   : > { %1064 = vmatmul.msk.f32.gmra.mxu1 %vm268_vm2, %v410_v3 }
  0x96   : > { %1074 = vmatmul.msk.f32.gmra.mxu2 %vm268_vm2, %v227_v56  ;;  %1084 = vmatmul.msk.f32.gmra.mxu3 %vm268_vm2, %v546_v4 }
  0x98   : > { %1094 = vmatmul.msk.f32.gmra.mxu0 %vm268_vm2, %v609_v11 }
  0x9a   : > { %v1537_v16 = vpop.f32.mrf.mxu1 }
  0x9d   : > { %1065 = vmatmul.msk.f32.gmra.mxu1 %vm268_vm2, %v607_v7  ;;  %v306_v19 = vpop.f32.mrf.mxu0 }
  0x9e   : > { %1075 = vmatmul.msk.f32.gmra.mxu2 %vm268_vm2, %v229_v9  ;;  %1085 = vmatmul.msk.f32.gmra.mxu3 %vm268_vm2, %v731_v17 }
  0xa0   : > { %1095 = vmatmul.msk.f32.gmra.mxu0 %vm268_vm2, %v794_v20 }
  0xa1   : > { %v1546_v22 = vpop.f32.mrf.mxu2  ;;  %v1548_v23 = vpop.f32.mrf.mxu3 }
  0xa2   : > { %v1550_v25 = vpop.f32.mrf.mxu1 }
  0xa5   : > { %1066 = vmatmul.msk.f32.gmra.mxu1 %vm268_vm2, %v609_v11  ;;  %v309_v27 = vpop.f32.mrf.mxu0 }
  0xa6   : > { %1076 = vmatmul.msk.f32.gmra.mxu2 %vm268_vm2, %v230_v10  ;;  %1086 = vmatmul.msk.f32.gmra.mxu3 %vm268_vm2, %v733_v26 }
  0xa8   : > { %1096 = vmatmul.msk.f32.gmra.mxu0 %vm268_vm2, %v796_v28 }
  0xa9   : > { %v1558_v29 = vpop.f32.mrf.mxu2  ;;  %v1560_v30 = vpop.f32.mrf.mxu3 }
  0xaa   : > { %v366_v31 = vpop.f32.mrf.mxu1 }
  0xab   : > { %v367_v60 = vadd.f32 %v366_v31, %v306_v19 }
  0xad   : > { %v573_v32 = vpop.f32.mrf.mxu0 }
  0xb1   : > { %v449_v33 = vpop.f32.mrf.mxu2  ;;  %v509_v34 = vpop.f32.mrf.mxu3 }
  0xb2   : > { %v369_v35 = vpop.f32.mrf.mxu1  ;;  %v473_v62 = vadd.f32 %v449_v33, %v367_v60 }
  0xb3   : > { %v370_v3 = vadd.f32 %v369_v35, %v309_v27 }
  0xb4   : > { %v533_v1 = vadd.f32 %v509_v34, %v473_v62 }
  0xb5   : > { %v576_v36 = vpop.f32.mrf.mxu0 }
  0xb6   : > { %v597_v5 = vadd.f32 %v573_v32, %v533_v1 }
  0xb9   : > { %v452_v37 = vpop.f32.mrf.mxu2  ;;  %v512_v38 = vpop.f32.mrf.mxu3 }
  0xba   : > { %v372_v39 = vpop.f32.mrf.mxu1  ;;  %v474_v6 = vadd.f32 %v452_v37, %v370_v3 }
  0xbb   : > { %v373_v13 = vadd.f32 %v372_v39, %v1537_v16 }
  0xbc   : > { %v534_v10 = vadd.f32 %v512_v38, %v474_v6 }
  0xbd   : > { %v579_v40 = vpop.f32.mrf.mxu0 }
  0xbe   : > { %v598_v18 = vadd.f32 %v576_v36, %v534_v10 }
  0xc1   : > { %v455_v41 = vpop.f32.mrf.mxu2  ;;  %v515_v42 = vpop.f32.mrf.mxu3 }
  0xc2   : > { %v375_v43 = vpop.f32.mrf.mxu1  ;;  %v475_v19 = vadd.f32 %v455_v41, %v373_v13 }
  0xc3   : > { %v376_v33 = vadd.f32 %v375_v43, %v1550_v25 }
  0xc4   : > { %v535_v28 = vadd.f32 %v515_v42, %v475_v19 }
  0xc5   : > { %v1562_v44 = vpop.f32.mrf.mxu0 }
  0xc6   : > { %v599_v36 = vadd.f32 %v579_v40, %v535_v28 }
  0xc9   : > { %v458_v45 = vpop.f32.mrf.mxu2  ;;  %v518_v46 = vpop.f32.mrf.mxu3 }
  0xca   : > { %v1564_v47 = vpop.f32.mrf.mxu1  ;;  %v476_v37 = vadd.f32 %v458_v45, %v376_v33 }
  0xcb   : > { %v379_v25 = vadd.f32 %v1564_v47, %v1546_v22 }
  0xcc   : > { %v536_v62 = vadd.f32 %v518_v46, %v476_v37 }
  0xcd   : > { %v1566_v48 = vpop.f32.mrf.mxu0 }
  0xce   : > { %v600_v40 = vadd.f32 %v1562_v44, %v536_v62 }
  0xd1   : > { %v1568_v49 = vpop.f32.mrf.mxu2  ;;  %v1570_v50 = vpop.f32.mrf.mxu3 }
  0xd2   : > { %v1572_v51 = vpop.f32.mrf.mxu1  ;;  %v477_v45 = vadd.f32 %v1568_v49, %v379_v25 }
  0xd3   : > { %v382_v22 = vadd.f32 %v1572_v51, %v1558_v29 }
  0xd5   : > { %v1574_v52 = vpop.f32.mrf.mxu0 }
  0xd9   : > { %v1576_v53 = vpop.f32.mrf.mxu2  ;;  %v1578_v54 = vpop.f32.mrf.mxu3 }
  0xda   : > { %v1580_v55 = vpop.f32.mrf.mxu1  ;;  %v478_v13 = vadd.f32 %v1576_v53, %v382_v22 }
  0xdb   : > { %v385_v29 = vadd.f32 %v1580_v55, %v1548_v23 }
  0xdd   : > { %v1582_v56 = vpop.f32.mrf.mxu0 }
  0xe1   : > { %v1584_v57 = vpop.f32.mrf.mxu2  ;;  %v1586_v58 = vpop.f32.mrf.mxu3 }
  0xe2   : > { %v1588_v59 = vpop.f32.mrf.mxu1  ;;  %v479_v53 = vadd.f32 %v1584_v57, %v385_v29 }
  0xe3   : > { %v388_v55 = vadd.f32 %v1588_v59, %v1560_v30 }
  0xe4   : > { %v539_v33 = vadd.f32 %v1586_v58, %v479_v53 }
  0xe5   : > { %v1590_v61 = vpop.f32.mrf.mxu0 }
  0xe6   : > { %v603_v57 = vadd.f32 %v1582_v56, %v539_v33 }
  0xe9   : > { %v1592_v63 = vpop.f32.mrf.mxu2  ;;  %v1594_v0 = vpop.f32.mrf.mxu3 }
  0xea   : > { %v636_v2 = vpop.f32.mrf.mxu1 }
  0xeb   : > { %v660_v7 = vadd.f32 %v636_v2, %v597_v5 }
  0xed   : > { %v823_v4 = vpop.f32.mrf.mxu0 }
  0xf1   : > { %v696_v8 = vpop.f32.mrf.mxu2  ;;  %v760_v9 = vpop.f32.mrf.mxu3 }
  0xf2   : > { %v720_v11 = vadd.f32 %v696_v8, %v660_v7  ;;  %v639_v12 = vpop.f32.mrf.mxu1 }
  0xf3   : > { %v661_v21 = vadd.f32 %v639_v12, %v598_v18 }
  0xf4   : > { %v784_v14 = vadd.f32 %v760_v9, %v720_v11  ;;  %v537_v9 = vadd.f32 %v1570_v50, %v477_v45 }
  0xf5   : > { %v826_v17 = vpop.f32.mrf.mxu0 }
  0xf6   : > { %v847_v20 = vadd.f32 %v823_v4, %v784_v14  ;;  %v601_v49 = vadd.f32 %v1566_v48, %v537_v9 }
  0xf8   : > { %v859_v24 = vadd.f32 %v1601_v15, %v847_v20  ;;  %v538_v20 = vadd.f32 %v1578_v54, %v478_v13 }
  0xf9   : > { %v699_v26 = vpop.f32.mrf.mxu2  ;;  %v763_v27 = vpop.f32.mrf.mxu3 }
  0xfa   : > { %v867_v31 = vmax.f32 %v859_v24, 0.0  ;;  %v721_v16 = vadd.f32 %v699_v26, %v661_v21  ;;  %v642_v32 = vpop.f32.mrf.mxu1  ;;  %v602_v48 = vadd.f32 %v1574_v52, %v538_v20 }
  0xfb   : > { %v662_v39 = vadd.f32 %v642_v32, %v599_v36  ;;  %v480_v36 = vadd.f32 %v1592_v63, %v388_v55 }
  0xfc   : > { %875 = vst [vmem:[%s1607_s9] sm:$0xff] %v867_v31  ;;  %v785_v34 = vadd.f32 %v763_v27, %v721_v16 }
  0xfd   : > { %v829_v35 = vpop.f32.mrf.mxu0 }
  0xfe   : > { %v848_v38 = vadd.f32 %v826_v17, %v785_v34 }
 0x100   : > { %v860_v41 = vadd.f32 %v1601_v15, %v848_v38 }
 0x101   : > { %v702_v60 = vpop.f32.mrf.mxu2  ;;  %v766_v42 = vpop.f32.mrf.mxu3 }
 0x102   : > { %v868_v1 = vmax.f32 %v860_v41, 0.0  ;;  %v722_v2 = vadd.f32 %v702_v60, %v662_v39  ;;  %v645_v3 = vpop.f32.mrf.mxu1 }
 0x103   : > { %v663_v6 = vadd.f32 %v645_v3, %v600_v40 }
 0x104   : > { %876 = vst [vmem:[%s1607_s9 + $0x8] sm:$0xff] %v868_v1  ;;  %v786_v43 = vadd.f32 %v766_v42, %v722_v2  ;;  %v540_v42 = vadd.f32 %v1594_v0, %v480_v36 }
 0x105   : > { %v832_v4 = vpop.f32.mrf.mxu0 }
 0x106   : > { %v849_v5 = vadd.f32 %v829_v35, %v786_v43  ;;  %v604_v56 = vadd.f32 %v1590_v61, %v540_v42 }
 0x108   : > { %v861_v7 = vadd.f32 %v1601_v15, %v849_v5 }
 0x109   : > { %v705_v8 = vpop.f32.mrf.mxu2  ;;  %v769_v46 = vpop.f32.mrf.mxu3 }
 0x10a   : > { %v869_v10 = vmax.f32 %v861_v7, 0.0  ;;  %v723_v11 = vadd.f32 %v705_v8, %v663_v6  ;;  %v648_v12 = vpop.f32.mrf.mxu1 }
 0x10b   : > { %v664_v17 = vadd.f32 %v648_v12, %v601_v49 }
 0x10c   : > { %877 = vst [vmem:[%s1607_s9 + $0x10] sm:$0xff] %v869_v10  ;;  %v787_v47 = vadd.f32 %v769_v46, %v723_v11 }
 0x10d   : > { %v835_v44 = vpop.f32.mrf.mxu0 }
 0x10e   : > { %v850_v14 = vadd.f32 %v832_v4, %v787_v47 }
 0x110   : > { %v862_v18 = vadd.f32 %v1601_v15, %v850_v14 }
 0x111   : > { %v708_v19 = vpop.f32.mrf.mxu2  ;;  %v772_v50 = vpop.f32.mrf.mxu3 }
 0x112   : > { %v870_v21 = vmax.f32 %v862_v18, 0.0  ;;  %v724_v24 = vadd.f32 %v708_v19, %v664_v17  ;;  %v651_v26 = vpop.f32.mrf.mxu1 }
 0x113   : > { %v665_v31 = vadd.f32 %v651_v26, %v602_v48 }
 0x114   : > { %878 = vst [vmem:[%s1607_s9 + $0x18] sm:$0xff] %v870_v21  ;;  %v788_v51 = vadd.f32 %v772_v50, %v724_v24 }
 0x115   : > { %v838_v28 = vpop.f32.mrf.mxu0 }
 0x116   : > { %v851_v27 = vadd.f32 %v835_v44, %v788_v51 }
 0x118   : > { %v863_v16 = vadd.f32 %v1601_v15, %v851_v27 }
 0x119   : > { %v711_v32 = vpop.f32.mrf.mxu2  ;;  %v775_v54 = vpop.f32.mrf.mxu3 }
 0x11a   : > { %v871_v34 = vmax.f32 %v863_v16, 0.0  ;;  %v725_v35 = vadd.f32 %v711_v32, %v665_v31  ;;  %v654_v23 = vpop.f32.mrf.mxu1 }
 0x11b   : > { %v666_v38 = vadd.f32 %v654_v23, %v603_v57 }
 0x11c   : > { %879 = vst [vmem:[%s1607_s9 + $0x20] sm:$0xff] %v871_v34  ;;  %v789_v52 = vadd.f32 %v775_v54, %v725_v35 }
 0x11d   : > { %v841_v41 = vpop.f32.mrf.mxu0 }
 0x11e   : > { %v852_v37 = vadd.f32 %v838_v28, %v789_v52 }
 0x120   : > { %v864_v39 = vadd.f32 %v1601_v15, %v852_v37 }
 0x121   : > { %v714_v58 = vpop.f32.mrf.mxu2  ;;  %v778_v60 = vpop.f32.mrf.mxu3 }
 0x122   : > { %v872_v62 = vmax.f32 %v864_v39, 0.0  ;;  %v726_v1 = vadd.f32 %v714_v58, %v666_v38  ;;  %v657_v59 = vpop.f32.mrf.mxu1 }
 0x123   : > { %v667_v2 = vadd.f32 %v657_v59, %v604_v56 }
 0x124   : > { %880 = vst [vmem:[%s1607_s9 + $0x28] sm:$0xff] %v872_v62  ;;  %v790_v30 = vadd.f32 %v778_v60, %v726_v1 }
 0x125   : > { %v844_v40 = vpop.f32.mrf.mxu0 }
 0x126   : > { %v853_v63 = vadd.f32 %v841_v41, %v790_v30 }
 0x128   : > { %v865_v3 = vadd.f32 %v1601_v15, %v853_v63 }
 0x129   : > { %v717_v25 = vpop.f32.mrf.mxu2  ;;  %v781_v43 = vpop.f32.mrf.mxu3 }
 0x12a   : > { %v873_v4 = vmax.f32 %v865_v3, 0.0  ;;  %v727_v0 = vadd.f32 %v717_v25, %v667_v2 }
 0x12c   : > { %881 = vst [vmem:[%s1607_s9 + $0x30] sm:$0xff] %v873_v4  ;;  %v791_v45 = vadd.f32 %v781_v43, %v727_v0 }
 0x12e   : > { %v854_v61 = vadd.f32 %v844_v40, %v791_v45 }
 0x130   : > { %v866_v5 = vadd.f32 %v1601_v15, %v854_v61 }
 0x132   : > { %v874_v6 = vmax.f32 %v866_v5, 0.0 }
 0x134   : > { %882 = vst [vmem:[%s1607_s9 + $0x38] sm:$0xff] %v874_v6 }
 0x135   : > { %1192 = shalt.err (!%p1189_p5)
}
 0x136   : > { %s1245_s5 = smov 128   ;;  %s1246_s7 = smov 8  }
 0x137   : > { %1107 = dma.vmem_to_hbm [thread:$0]  (%p1307_p4), %s898_s21, 1024, %s900_s23, %s884_s15, %s1245_s5, %s1245_s5, %s1246_s7  }
 0x138 PF: > { %p1113_p6 = scmp.ge.s32.totalorder %s1243_s17, 2  ;;  %s914_s8 = sand.u32 1, %s1223_s12  }
 0x139   : > { %s915_s9 = scalar_lea.sflag [#allocation3], %s914_s8 }
 0x13a   : > { %p1110_p7 = pnand %p1113_p6, %p1314_p8 }
 0x13c   : > { %p1111_p9 = pneg %p1110_p7 }
 0x13e   : > { %1218 = dma.done.wait (%p1111_p9), %s915_s9, 1024  }
 0x13f   : > { %1220 = vsyncadd (%p1111_p9), %s915_s9, 4294966272  ;;  %s16_s17 = sadd.s32 1, %s1243_s17   ;;  %s1690_s12 = smov %s1227_s13 }
 0x140   : > { %p13_p10 = scmp.ge.s32.totalorder %s16_s17, 10   ;;  %s1691_s13 = smov %s1231_s14 }
 0x141   : > { %s1692_s14 = smov %s1320_s25  ;;  %s1693_s15 = smov %s1239_s16 }
 0x142   : > { %s1694_s16 = smov %s1696_s20  ;;  %15 = sbr.rel (!%p13_p10) target bundleno = 4 (0x4), region = 81 }
 0x147   :  { %921 = vsyncpa [#allocation3], 1 }
 0x148   :  { %923 = vsyncpa [#allocation3 + $0x1], 1 }

// kernel: tpu_custom_call.1
= control target key start
LH: loop header
LB: loop body
LE: loop exit
PB: predicated region body
PF: predicated region fallthrough
CT: control target
= control target key end

     0   :  { %8 = vsyncpa [#allocation3], 0  ;;  %s1684_s0 = inlined_call_operand.vmem [shape: f32[8,6,18,4], index: 0, kind: input, shape index: {}]   ;;  %s1685_s1 = inlined_call_operand.vmem [shape: f32[9,4,128], index: 1, kind: input, shape index: {}]   ;;  %s1686_s2 = inlined_call_operand.vmem [shape: f32[1,128], index: 2, kind: input, shape index: {}]   ;;  %s1687_s3 = inlined_call_operand.hbm [shape: f32[8,64,128], index: 3, kind: output, shape index: {}]  }
   0x1   :  { %10 = vsyncpa [#allocation3 + $0x1], 0  ;;  %s1267_s12 = smov 0   ;;  %s1269_s13 = smov 0  }
   0x2   :  { %s1271_s14 = smov 0   ;;  %s1273_s15 = smov 0  }
   0x3   :  { %s1275_s16 = smov 0   ;;  %s1277_s17 = smov 0  }
   0x4 LB: > { %s999_s18 = sadd.s32 4294967295, %s1243_s17   ;;  %s1000_s19 = sadd.s32 4294967294, %s1243_s17   ;;  %s1243_s17 = sphi %s1277_s17, %s16_s17   ;;  %s1239_s16 = sphi %s1275_s16, %s1694_s16   ;;  %s1235_s15 = sphi %s1273_s15, %s1693_s15   ;;  %s1231_s14 = sphi %s1271_s14, %s1692_s14   ;;  %s1227_s13 = sphi %s1269_s13, %s1691_s13   ;;  %s1223_s12 = sphi %s1267_s12, %s1690_s12  }
   0x5   : > { %s25_s20 = sadd.s32 1, %s1239_s16  ;;  %s115_s21 = sadd.s32 1, %s1231_s14 }
   0x6   : > { %p26_p0 = scmp.ge.s32.totalorder %s25_s20, 8  ;;  %p125_p1 = scmp.ne.s32.totalorder %s1231_s14, %s1227_s13 }
   0x7   : > { %p126_p2 = scmp.eq.s32.totalorder %s999_s18, 7  ;;  %p131_p3 = scmp.ne.s32.totalorder %s1227_s13, %s1223_s12 }
   0x8   : > { %s1696_s20 = smov (%p26_p0, %s25_s20), 0  ;;  %p132_p5 = scmp.eq.s32.totalorder %s1000_s19, 7 }
   0x9   : > { %p1307_p4 = por %p126_p2, %p125_p1  ;;  %s110_s23 = ssub.s32 %s1239_s16, %s1696_s20 }
   0xa   : > { %p1005_p6 = scmp.ge.s32.totalorder %s1243_s17, 1  ;;  %p113_p7 = scmp.eq.s32.totalorder %s110_s23, 0 }
   0xb   : > { %p1314_p8 = por %p132_p5, %p131_p3  ;;  %p171_p9 = scmp.lt.s32.totalorder %s1243_s17, 9 }
   0xc   : > { %s1320_s25 = scalar_select %p113_p7, %s1231_s14, %s115_s21  }
   0xd   : > { %p172_p10 = pnand %p1005_p6, %p171_p9 }
   0xe   : > { %p202_p11 = scmp.lt.s32.totalorder (!%p172_p10), %s1235_s15, 7  ;;  %s199_s5 = sand.u32 (!%p172_p10), 1, %s1227_s13  }
   0xf   : > { %175 = sbr.rel (%p172_p10) target bundleno = 312 (0x138), region = 32  ;;  %s1006_s8 = sshll.u32 (!%p172_p10), %s199_s5, 6 }
  0x10   : > { %s1607_s9 = scalar_lea.vmem (!%p172_p10), [#allocation2], %s1006_s8  ;;  %s1185_s30 = scalar_lea.hbm (!%p172_p10), %s1687_s3, 512 }
  0x11   : > { %s897_s21 = sshll.u32 (!%p172_p10), %s1607_s9, 4  ;;  %s898_s21 = int_to_ptr.vmem [resolvable:$true] %s897_s21 }
  0x14   : > { %v1008_v0 = vld [vmem:[%s1685_s1 + $0x4] sm:$0xf]  ;;  %vm285_vm0 = vcmask 1043456   ;;  %v1027_v1 = vld [vmem:[%s1685_s1 + $0x8] sm:$0xf]  ;;  %s203_s7 = scalar_select %p202_p11, %s1235_s15, 7 }
  0x15   : > { %1103 = vmatpush.msk.msra.mxu1 %vm285_vm0, %v1008_v0  ;;  %1104 = vmatpush.msk.msra.mxu2 %vm285_vm0, %v1008_v0  ;;  %v1037_v2 = vld [vmem:[%s1685_s1 + $0xc] sm:$0xf]  ;;  %v232_v3 = vld [vmem:[%s1685_s1] sm:$0xf]  ;;  %v1047_v4 = vld [vmem:[%s1685_s1 + $0x10] sm:$0xf] }
  0x16   : > { %1105 = vmatpush.msk.msra.mxu3 %vm285_vm0, %v1008_v0  ;;  %s1106_s10 = smul.u32 144, %s203_s7  ;;  %1009 = vmatpush.msk.msra.mxu0 %vm285_vm0, %v1008_v0  ;;  %vm245_vm1 = vcmask 1046528   ;;  %vm268_vm2 = vcmask 31744   ;;  %v1067_v14 = vld [vmem:[%s1685_s1 + $0x18] sm:$0xf]  ;;  %vm390_vm3 = vcmask 1045504  }
  0x17   : > { %1028 = vmatpush.msk.msrb.mxu2 %vm285_vm0, %v1027_v1  ;;  %1018 = vmatpush.msk.msrb.mxu1 %vm285_vm0, %v232_v3  ;;  %v1077_v24 = vld [vmem:[%s1685_s1 + $0x1c] sm:$0xf]  ;;  %v1057_v29 = vld [vmem:[%s1685_s1 + $0x14] sm:$0xf]  ;;  %v1087_v32 = vld [vmem:[%s1685_s1 + $0x20] sm:$0xf] }
  0x18   : > { %1038 = vmatpush.msk.msrb.mxu3 %vm285_vm0, %v1037_v2  ;;  %1048 = vmatpush.msk.msrb.mxu0 %vm285_vm0, %v1047_v4  ;;  %s1350_s19 = scalar_lea.vmem %s1684_s0, %s1106_s10  ;;  %s1102_s10 = sshll.u32 %s1235_s15, 6 }
  0x19   : > { %v1353_v5 = vld [vmem:[%s1350_s19 + $0x18] sm:$0xff]  ;;  %v1356_v6 = vld [vmem:[%s1350_s19 + $0x20] sm:$0xff]  ;;  %v1359_v7 = vld [vmem:[%s1350_s19 + $0x30] sm:$0xff]  ;;  %s884_s15 = scalar_lea.sflag [#allocation3], %s199_s5 }
  0x1a   : > { %v251_v8 = vrot.slane %v1353_v5, 1  ;;  %v252_v9 = vrot.slane %v1356_v6, 1  ;;  %v1364_v10 = vld [vmem:[%s1350_s19 + $0x38] sm:$0xff]  ;;  %v256_v11 = vrot.slane %v1359_v7, 1  ;;  %v1368_v12 = vld [vmem:[%s1350_s19 + $0x48] sm:$0xff]  ;;  %v1371_v13 = vld [vmem:[%s1350_s19 + $0x50] sm:$0xff] }
  0x1b   : > { %v257_v15 = vrot.slane %v1364_v10, 1  ;;  %v261_v16 = vrot.slane %v1368_v12, 1  ;;  %v262_v17 = vrot.slane %v1371_v13, 1  ;;  %v219_v18 = vld [vmem:[%s1350_s19 + $0x28] sm:$0x3]  ;;  %v214_v19 = vld [vmem:[%s1350_s19] sm:$0xff] }
  0x1c   : > { %v253_v20 = vsel %vm245_vm1, %v251_v8, %v252_v9  ;;  %v1383_v21 = vld [vmem:[%s1350_s19 + $0x40] sm:$0x3]  ;;  %v215_v22 = vld [vmem:[%s1350_s19 + $0x8] sm:$0xff]  ;;  %v246_v23 = vrot.slane %v214_v19, 1  ;;  %v1397_v28 = vld [vmem:[%s1350_s19 + $0x58] sm:$0x3] }
  0x1d   : > { %1012 = vmatmul.msk.f32.vlgmr.msra.gmra.mxu1 %vm268_vm2, %v253_v20  ;;  %v1391_v25 = vsel %vm245_vm1, %v256_v11, %v257_v15  ;;  %v1394_v26 = vsel %vm245_vm1, %v261_v16, %v262_v17  ;;  %v247_v27 = vrot.slane %v215_v22, 1  ;;  %v254_v30 = vrot.slane %v219_v18, 1  ;;  %v216_v31 = vld [vmem:[%s1350_s19 + $0x10] sm:$0x3]  ;;  %v227_v56 = vld [vmem:[%s1350_s19 + $0x68] sm:$0xff]  ;;  %v226_v59 = vld [vmem:[%s1350_s19 + $0x60] sm:$0xff] }
  0x1e   : > { %1014 = vmatmul.msk.f32.vlgmr.msra.gmra.mxu2 %vm268_vm2, %v1391_v25  ;;  %1016 = vmatmul.msk.f32.vlgmr.msra.gmra.mxu3 %vm268_vm2, %v1394_v26  ;;  %v259_v33 = vrot.slane %v1383_v21, 1  ;;  %v264_v35 = vrot.slane %v1397_v28, 1  ;;  %v249_v36 = vrot.slane %v216_v31, 1  ;;  %v391_v41 = vrot.slane %v214_v19, 2  ;;  %v228_v0 = vld [vmem:[%s1350_s19 + $0x70] sm:$0x3] }
  0x1f   : > { %v248_v34 = vsel %vm245_vm1, %v246_v23, %v247_v27  ;;  %1068 = vmatpush.msk.msra.mxu2 %vm285_vm0, %v1067_v14  ;;  %1078 = vmatpush.msk.msra.mxu3 %vm285_vm0, %v1077_v24  ;;  %v255_v37 = vsel %vm245_vm1, %v252_v9, %v254_v30  ;;  %v392_v42 = vrot.slane %v215_v22, 2  ;;  %v394_v44 = vrot.slane %v216_v31, 2  ;;  %v229_v9 = vld [vmem:[%s1350_s19 + $0x78] sm:$0xff] }
  0x20   : > { %1010 = vmatmul.msk.f32.vlgmr.msra.gmra.mxu0 %vm268_vm2, %v248_v34  ;;  %1058 = vmatpush.msk.msra.mxu1 %vm285_vm0, %v1057_v29  ;;  %v1420_v38 = vsel %vm245_vm1, %v257_v15, %v259_v33  ;;  %v1423_v39 = vsel %vm245_vm1, %v262_v17, %v264_v35  ;;  %v250_v40 = vsel %vm245_vm1, %v247_v27, %v249_v36  ;;  %v396_v46 = vrot.slane %v1353_v5, 2 }
  0x21   : > { %1088 = vmatpush.msk.msra.mxu0 %vm285_vm0, %v1087_v32  ;;  %v393_v43 = vsel %vm390_vm3, %v391_v41, %v392_v42  ;;  %v395_v45 = vsel %vm390_vm3, %v392_v42, %v394_v44  ;;  %v397_v47 = vrot.slane %v1356_v6, 2  ;;  %v399_v49 = vrot.slane %v219_v18, 2  ;;  %v231_v18 = vld [vmem:[%s1350_s19 + $0x88] sm:$0x3] }
  0x22   : > { %v401_v51 = vrot.slane %v1359_v7, 2  ;;  %v402_v52 = vrot.slane %v1364_v10, 2  ;;  %v404_v54 = vrot.slane %v1383_v21, 2  ;;  %v406_v57 = vrot.slane %v1368_v12, 2 }
  0x23   : > { %v398_v48 = vsel %vm390_vm3, %v396_v46, %v397_v47  ;;  %v400_v50 = vsel %vm390_vm3, %v397_v47, %v399_v49  ;;  %v407_v58 = vrot.slane %v1371_v13, 2  ;;  %v542_v60 = vrot.slane %v226_v59, 1 }
  0x24   : > { %v403_v53 = vsel %vm390_vm3, %v401_v51, %v402_v52  ;;  %v405_v55 = vsel %vm390_vm3, %v402_v52, %v404_v54  ;;  %v543_v61 = vrot.slane %v227_v56, 1  ;;  %v409_v1 = vrot.slane %v1397_v28, 2 }
  0x25   : > { %1013 = vmatmul.msk.f32.gmra.mxu1 %vm268_vm2, %v255_v37  ;;  %v408_v62 = vsel %vm390_vm3, %v406_v57, %v407_v58  ;;  %v545_v2 = vrot.slane %v228_v0, 1  ;;  %v608_v8 = vrot.slane %v228_v0, 2  ;;  %v792_v14 = vrot.slane %v229_v9, 2 }
  0x26   : > { %1015 = vmatmul.msk.f32.gmra.mxu2 %vm268_vm2, %v1420_v38  ;;  %1017 = vmatmul.msk.f32.gmra.mxu3 %vm268_vm2, %v1423_v39  ;;  %v544_v63 = vsel %vm245_vm1, %v542_v60, %v543_v61  ;;  %v410_v3 = vsel %vm390_vm3, %v407_v58, %v409_v1  ;;  %v732_v21 = vrot.slane %v231_v18, 1  ;;  %v795_v24 = vrot.slane %v231_v18, 2 }
  0x27   : > { %v546_v4 = vsel %vm245_vm1, %v543_v61, %v545_v2 }
  0x28   : > { %1011 = vmatmul.msk.f32.gmra.mxu0 %vm268_vm2, %v250_v40 }
  0x2d   : > { %1019 = vmatmul.msk.f32.vlgmr.msrb.gmra.mxu1 %vm268_vm2, %v214_v19 }
  0x2e   : > { %1029 = vmatmul.msk.f32.vlgmr.msrb.gmra.mxu2 %vm268_vm2, %v393_v43  ;;  %1039 = vmatmul.msk.f32.vlgmr.msrb.gmra.mxu3 %vm268_vm2, %v1353_v5 }
  0x30   : > { %1049 = vmatmul.msk.f32.vlgmr.msrb.gmra.mxu0 %vm268_vm2, %v253_v20 }
  0x35   : > { %1020 = vmatmul.msk.f32.gmra.mxu1 %vm268_vm2, %v215_v22 }
  0x36   : > { %1030 = vmatmul.msk.f32.gmra.mxu2 %vm268_vm2, %v395_v45  ;;  %1040 = vmatmul.msk.f32.gmra.mxu3 %vm268_vm2, %v1356_v6 }
  0x38   : > { %1050 = vmatmul.msk.f32.gmra.mxu0 %vm268_vm2, %v255_v37 }
  0x3d   : > { %1021 = vmatmul.msk.f32.gmra.mxu1 %vm268_vm2, %v1353_v5  ;;  %v605_v5 = vrot.slane %v226_v59, 2 }
  0x3e   : > { %1031 = vmatmul.msk.f32.gmra.mxu2 %vm268_vm2, %v398_v48  ;;  %1041 = vmatmul.msk.f32.gmra.mxu3 %vm268_vm2, %v1359_v7 }
  0x40   : > { %1051 = vmatmul.msk.f32.gmra.mxu0 %vm268_vm2, %v1391_v25 }
  0x45   : > { %1022 = vmatmul.msk.f32.gmra.mxu1 %vm268_vm2, %v1356_v6  ;;  %v606_v6 = vrot.slane %v227_v56, 2 }
  0x46   : > { %1032 = vmatmul.msk.f32.gmra.mxu2 %vm268_vm2, %v400_v50  ;;  %1042 = vmatmul.msk.f32.gmra.mxu3 %vm268_vm2, %v1364_v10 }
  0x47   : > { %v609_v11 = vsel %vm390_vm3, %v606_v6, %v608_v8 }
  0x48   : > { %1052 = vmatmul.msk.f32.gmra.mxu0 %vm268_vm2, %v1420_v38 }
  0x4d   : > { %1023 = vmatmul.msk.f32.gmra.mxu1 %vm268_vm2, %v1359_v7 }
  0x4e   : > { %1033 = vmatmul.msk.f32.gmra.mxu2 %vm268_vm2, %v403_v53  ;;  %1043 = vmatmul.msk.f32.gmra.mxu3 %vm268_vm2, %v1368_v12 }
  0x50   : > { %1053 = vmatmul.msk.f32.gmra.mxu0 %vm268_vm2, %v1394_v26 }
  0x55   : > { %1024 = vmatmul.msk.f32.gmra.mxu1 %vm268_vm2, %v1364_v10 }
  0x56   : > { %1034 = vmatmul.msk.f32.gmra.mxu2 %vm268_vm2, %v405_v55  ;;  %1044 = vmatmul.msk.f32.gmra.mxu3 %vm268_vm2, %v1371_v13 }
  0x58   : > { %1054 = vmatmul.msk.f32.gmra.mxu0 %vm268_vm2, %v1423_v39 }
  0x5d   : > { %1025 = vmatmul.msk.f32.gmra.mxu1 %vm268_vm2, %v1368_v12 }
  0x5e   : > { %1035 = vmatmul.msk.f32.gmra.mxu2 %vm268_vm2, %v408_v62  ;;  %1045 = vmatmul.msk.f32.gmra.mxu3 %vm268_vm2, %v226_v59 }
  0x60   : > { %1055 = vmatmul.msk.f32.gmra.mxu0 %vm268_vm2, %v544_v63 }
  0x65   : > { %1026 = vmatmul.msk.f32.gmra.mxu1 %vm268_vm2, %v1371_v13 }
  0x66   : > { %1036 = vmatmul.msk.f32.gmra.mxu2 %vm268_vm2, %v410_v3  ;;  %1046 = vmatmul.msk.f32.gmra.mxu3 %vm268_vm2, %v227_v56 }
  0x68   : > { %1056 = vmatmul.msk.f32.gmra.mxu0 %vm268_vm2, %v546_v4 }
  0x6d   : > { %1059 = vmatmul.msk.f32.vlgmr.msra.gmra.mxu1 %vm268_vm2, %v398_v48 }
  0x6e   : > { %1069 = vmatmul.msk.f32.vlgmr.msra.gmra.mxu2 %vm268_vm2, %v1359_v7  ;;  %1079 = vmatmul.msk.f32.vlgmr.msra.gmra.mxu3 %vm268_vm2, %v1391_v25  ;;  %v607_v7 = vsel %vm390_vm3, %v605_v5, %v606_v6 }
  0x70   : > { %1089 = vmatmul.msk.f32.vlgmr.msra.gmra.mxu0 %vm268_vm2, %v403_v53 }
  0x75   : > { %1060 = vmatmul.msk.f32.gmra.mxu1 %vm268_vm2, %v400_v50 }
  0x76   : > { %1070 = vmatmul.msk.f32.gmra.mxu2 %vm268_vm2, %v1364_v10  ;;  %1080 = vmatmul.msk.f32.gmra.mxu3 %vm268_vm2, %v1420_v38  ;;  %v230_v10 = vld [vmem:[%s1350_s19 + $0x80] sm:$0xff]  ;;  %s896_s19 = scalar_lea.hbm %s1687_s3, %s1102_s10 }
  0x77   : > { %v793_v15 = vrot.slane %v230_v10, 2  ;;  %s899_s23 = sshll.u32 %s896_s19, 4  ;;  %s900_s23 = int_to_ptr.hbm [resolvable:$true] %s899_s23 }
  0x78   : > { %1090 = vmatmul.msk.f32.gmra.mxu0 %vm268_vm2, %v405_v55  ;;  %s1179_s26 = sshra.s32 %s900_s23, 4  ;;  %s1180_s26 = int_to_ptr.hbm [resolvable:$true] %s1179_s26 }
  0x79   : > { %v794_v20 = vsel %vm390_vm3, %v792_v14, %v793_v15  ;;  %v796_v28 = vsel %vm390_vm3, %v793_v15, %v795_v24  ;;  %v1601_v15 = vld [vmem:[%s1686_s2] ss:$0 sm:$0xff]  ;;  %s1181_s27 = scalar_lea.hbm %s1180_s26, 64  ;;  %p1186_p1 = scmp.lt.s32.totalorder %s1180_s26, %s1687_s3 }
  0x7a   : > { %p1182_p12 = scmp.ne.s32.totalorder %s1180_s26, %s1181_s27  ;;  %p1187_p2 = scmp.lt.s32.totalorder %s1185_s30, %s1181_s27 }
  0x7c   : > { %p1183_p13 = pnand %p1182_p12, %p1307_p4  ;;  %p1188_p3 = por %p1187_p2, %p1186_p1 }
  0x7d   : > { %1061 = vmatmul.msk.f32.gmra.mxu1 %vm268_vm2, %v403_v53 }
  0x7e   : > { %1071 = vmatmul.msk.f32.gmra.mxu2 %vm268_vm2, %v1368_v12  ;;  %1081 = vmatmul.msk.f32.gmra.mxu3 %vm268_vm2, %v1394_v26  ;;  %v729_v12 = vrot.slane %v229_v9, 1  ;;  %p1184_p0 = pneg %p1183_p13 }
  0x80   : > { %1091 = vmatmul.msk.f32.gmra.mxu0 %vm268_vm2, %v408_v62  ;;  %p1189_p5 = pnand %p1188_p3, %p1184_p0 }
  0x85   : > { %1062 = vmatmul.msk.f32.gmra.mxu1 %vm268_vm2, %v405_v55 }
  0x86   : > { %1072 = vmatmul.msk.f32.gmra.mxu2 %vm268_vm2, %v1371_v13  ;;  %1082 = vmatmul.msk.f32.gmra.mxu3 %vm268_vm2, %v1423_v39  ;;  %v730_v13 = vrot.slane %v230_v10, 1 }
  0x88   : > { %1092 = vmatmul.msk.f32.gmra.mxu0 %vm268_vm2, %v410_v3  ;;  %v731_v17 = vsel %vm245_vm1, %v729_v12, %v730_v13  ;;  %v733_v26 = vsel %vm245_vm1, %v730_v13, %v732_v21 }
  0x8d   : > { %1063 = vmatmul.msk.f32.gmra.mxu1 %vm268_vm2, %v408_v62 }
  0x8e   : > { %1073 = vmatmul.msk.f32.gmra.mxu2 %vm268_vm2, %v226_v59  ;;  %1083 = vmatmul.msk.f32.gmra.mxu3 %vm268_vm2, %v544_v63 }
  0x90   : > { %1093 = vmatmul.msk.f32.gmra.mxu0 %vm268_vm2, %v607_v7 }
  0x95   : > { %1064 = vmatmul.msk.f32.gmra.mxu1 %vm268_vm2, %v410_v3 }
  0x96   : > { %1074 = vmatmul.msk.f32.gmra.mxu2 %vm268_vm2, %v227_v56  ;;  %1084 = vmatmul.msk.f32.gmra.mxu3 %vm268_vm2, %v546_v4 }
  0x98   : > { %1094 = vmatmul.msk.f32.gmra.mxu0 %vm268_vm2, %v609_v11 }
  0x9a   : > { %v1537_v16 = vpop.f32.mrf.mxu1 }
  0x9d   : > { %1065 = vmatmul.msk.f32.gmra.mxu1 %vm268_vm2, %v607_v7  ;;  %v306_v19 = vpop.f32.mrf.mxu0 }
  0x9e   : > { %1075 = vmatmul.msk.f32.gmra.mxu2 %vm268_vm2, %v229_v9  ;;  %1085 = vmatmul.msk.f32.gmra.mxu3 %vm268_vm2, %v731_v17 }
  0xa0   : > { %1095 = vmatmul.msk.f32.gmra.mxu0 %vm268_vm2, %v794_v20 }
  0xa1   : > { %v1546_v22 = vpop.f32.mrf.mxu2  ;;  %v1548_v23 = vpop.f32.mrf.mxu3 }
  0xa2   : > { %v1550_v25 = vpop.f32.mrf.mxu1 }
  0xa5   : > { %1066 = vmatmul.msk.f32.gmra.mxu1 %vm268_vm2, %v609_v11  ;;  %v309_v27 = vpop.f32.mrf.mxu0 }
  0xa6   : > { %1076 = vmatmul.msk.f32.gmra.mxu2 %vm268_vm2, %v230_v10  ;;  %1086 = vmatmul.msk.f32.gmra.mxu3 %vm268_vm2, %v733_v26 }
  0xa8   : > { %1096 = vmatmul.msk.f32.gmra.mxu0 %vm268_vm2, %v796_v28 }
  0xa9   : > { %v1558_v29 = vpop.f32.mrf.mxu2  ;;  %v1560_v30 = vpop.f32.mrf.mxu3 }
  0xaa   : > { %v366_v31 = vpop.f32.mrf.mxu1 }
  0xab   : > { %v367_v60 = vadd.f32 %v366_v31, %v306_v19 }
  0xad   : > { %v573_v32 = vpop.f32.mrf.mxu0 }
  0xb1   : > { %v449_v33 = vpop.f32.mrf.mxu2  ;;  %v509_v34 = vpop.f32.mrf.mxu3 }
  0xb2   : > { %v369_v35 = vpop.f32.mrf.mxu1  ;;  %v473_v62 = vadd.f32 %v449_v33, %v367_v60 }
  0xb3   : > { %v370_v3 = vadd.f32 %v369_v35, %v309_v27 }
  0xb4   : > { %v533_v1 = vadd.f32 %v509_v34, %v473_v62 }
  0xb5   : > { %v576_v36 = vpop.f32.mrf.mxu0 }
  0xb6   : > { %v597_v5 = vadd.f32 %v573_v32, %v533_v1 }
  0xb9   : > { %v452_v37 = vpop.f32.mrf.mxu2  ;;  %v512_v38 = vpop.f32.mrf.mxu3 }
  0xba   : > { %v372_v39 = vpop.f32.mrf.mxu1  ;;  %v474_v6 = vadd.f32 %v452_v37, %v370_v3 }
  0xbb   : > { %v373_v13 = vadd.f32 %v372_v39, %v1537_v16 }
  0xbc   : > { %v534_v10 = vadd.f32 %v512_v38, %v474_v6 }
  0xbd   : > { %v579_v40 = vpop.f32.mrf.mxu0 }
  0xbe   : > { %v598_v18 = vadd.f32 %v576_v36, %v534_v10 }
  0xc1   : > { %v455_v41 = vpop.f32.mrf.mxu2  ;;  %v515_v42 = vpop.f32.mrf.mxu3 }
  0xc2   : > { %v375_v43 = vpop.f32.mrf.mxu1  ;;  %v475_v19 = vadd.f32 %v455_v41, %v373_v13 }
  0xc3   : > { %v376_v33 = vadd.f32 %v375_v43, %v1550_v25 }
  0xc4   : > { %v535_v28 = vadd.f32 %v515_v42, %v475_v19 }
  0xc5   : > { %v1562_v44 = vpop.f32.mrf.mxu0 }
  0xc6   : > { %v599_v36 = vadd.f32 %v579_v40, %v535_v28 }
  0xc9   : > { %v458_v45 = vpop.f32.mrf.mxu2  ;;  %v518_v46 = vpop.f32.mrf.mxu3 }
  0xca   : > { %v1564_v47 = vpop.f32.mrf.mxu1  ;;  %v476_v37 = vadd.f32 %v458_v45, %v376_v33 }
  0xcb   : > { %v379_v25 = vadd.f32 %v1564_v47, %v1546_v22 }
  0xcc   : > { %v536_v62 = vadd.f32 %v518_v46, %v476_v37 }
  0xcd   : > { %v1566_v48 = vpop.f32.mrf.mxu0 }
  0xce   : > { %v600_v40 = vadd.f32 %v1562_v44, %v536_v62 }
  0xd1   : > { %v1568_v49 = vpop.f32.mrf.mxu2  ;;  %v1570_v50 = vpop.f32.mrf.mxu3 }
  0xd2   : > { %v1572_v51 = vpop.f32.mrf.mxu1  ;;  %v477_v45 = vadd.f32 %v1568_v49, %v379_v25 }
  0xd3   : > { %v382_v22 = vadd.f32 %v1572_v51, %v1558_v29 }
  0xd5   : > { %v1574_v52 = vpop.f32.mrf.mxu0 }
  0xd9   : > { %v1576_v53 = vpop.f32.mrf.mxu2  ;;  %v1578_v54 = vpop.f32.mrf.mxu3 }
  0xda   : > { %v1580_v55 = vpop.f32.mrf.mxu1  ;;  %v478_v13 = vadd.f32 %v1576_v53, %v382_v22 }
  0xdb   : > { %v385_v29 = vadd.f32 %v1580_v55, %v1548_v23 }
  0xdd   : > { %v1582_v56 = vpop.f32.mrf.mxu0 }
  0xe1   : > { %v1584_v57 = vpop.f32.mrf.mxu2  ;;  %v1586_v58 = vpop.f32.mrf.mxu3 }
  0xe2   : > { %v1588_v59 = vpop.f32.mrf.mxu1  ;;  %v479_v53 = vadd.f32 %v1584_v57, %v385_v29 }
  0xe3   : > { %v388_v55 = vadd.f32 %v1588_v59, %v1560_v30 }
  0xe4   : > { %v539_v33 = vadd.f32 %v1586_v58, %v479_v53 }
  0xe5   : > { %v1590_v61 = vpop.f32.mrf.mxu0 }
  0xe6   : > { %v603_v57 = vadd.f32 %v1582_v56, %v539_v33 }
  0xe9   : > { %v1592_v63 = vpop.f32.mrf.mxu2  ;;  %v1594_v0 = vpop.f32.mrf.mxu3 }
  0xea   : > { %v636_v2 = vpop.f32.mrf.mxu1 }
  0xeb   : > { %v660_v7 = vadd.f32 %v636_v2, %v597_v5 }
  0xed   : > { %v823_v4 = vpop.f32.mrf.mxu0 }
  0xf1   : > { %v696_v8 = vpop.f32.mrf.mxu2  ;;  %v760_v9 = vpop.f32.mrf.mxu3 }
  0xf2   : > { %v720_v11 = vadd.f32 %v696_v8, %v660_v7  ;;  %v639_v12 = vpop.f32.mrf.mxu1 }
  0xf3   : > { %v661_v21 = vadd.f32 %v639_v12, %v598_v18 }
  0xf4   : > { %v784_v14 = vadd.f32 %v760_v9, %v720_v11  ;;  %v537_v9 = vadd.f32 %v1570_v50, %v477_v45 }
  0xf5   : > { %v826_v17 = vpop.f32.mrf.mxu0 }
  0xf6   : > { %v847_v20 = vadd.f32 %v823_v4, %v784_v14  ;;  %v601_v49 = vadd.f32 %v1566_v48, %v537_v9 }
  0xf8   : > { %v859_v24 = vadd.f32 %v1601_v15, %v847_v20  ;;  %v538_v20 = vadd.f32 %v1578_v54, %v478_v13 }
  0xf9   : > { %v699_v26 = vpop.f32.mrf.mxu2  ;;  %v763_v27 = vpop.f32.mrf.mxu3 }
  0xfa   : > { %v867_v31 = vmax.f32 %v859_v24, 0.0  ;;  %v721_v16 = vadd.f32 %v699_v26, %v661_v21  ;;  %v642_v32 = vpop.f32.mrf.mxu1  ;;  %v602_v48 = vadd.f32 %v1574_v52, %v538_v20 }
  0xfb   : > { %v662_v39 = vadd.f32 %v642_v32, %v599_v36  ;;  %v480_v36 = vadd.f32 %v1592_v63, %v388_v55 }
  0xfc   : > { %875 = vst [vmem:[%s1607_s9] sm:$0xff] %v867_v31  ;;  %v785_v34 = vadd.f32 %v763_v27, %v721_v16 }
  0xfd   : > { %v829_v35 = vpop.f32.mrf.mxu0 }
  0xfe   : > { %v848_v38 = vadd.f32 %v826_v17, %v785_v34 }
 0x100   : > { %v860_v41 = vadd.f32 %v1601_v15, %v848_v38 }
 0x101   : > { %v702_v60 = vpop.f32.mrf.mxu2  ;;  %v766_v42 = vpop.f32.mrf.mxu3 }
 0x102   : > { %v868_v1 = vmax.f32 %v860_v41, 0.0  ;;  %v722_v2 = vadd.f32 %v702_v60, %v662_v39  ;;  %v645_v3 = vpop.f32.mrf.mxu1 }
 0x103   : > { %v663_v6 = vadd.f32 %v645_v3, %v600_v40 }
 0x104   : > { %876 = vst [vmem:[%s1607_s9 + $0x8] sm:$0xff] %v868_v1  ;;  %v786_v43 = vadd.f32 %v766_v42, %v722_v2  ;;  %v540_v42 = vadd.f32 %v1594_v0, %v480_v36 }
 0x105   : > { %v832_v4 = vpop.f32.mrf.mxu0 }
 0x106   : > { %v849_v5 = vadd.f32 %v829_v35, %v786_v43  ;;  %v604_v56 = vadd.f32 %v1590_v61, %v540_v42 }
 0x108   : > { %v861_v7 = vadd.f32 %v1601_v15, %v849_v5 }
 0x109   : > { %v705_v8 = vpop.f32.mrf.mxu2  ;;  %v769_v46 = vpop.f32.mrf.mxu3 }
 0x10a   : > { %v869_v10 = vmax.f32 %v861_v7, 0.0  ;;  %v723_v11 = vadd.f32 %v705_v8, %v663_v6  ;;  %v648_v12 = vpop.f32.mrf.mxu1 }
 0x10b   : > { %v664_v17 = vadd.f32 %v648_v12, %v601_v49 }
 0x10c   : > { %877 = vst [vmem:[%s1607_s9 + $0x10] sm:$0xff] %v869_v10  ;;  %v787_v47 = vadd.f32 %v769_v46, %v723_v11 }
 0x10d   : > { %v835_v44 = vpop.f32.mrf.mxu0 }
 0x10e   : > { %v850_v14 = vadd.f32 %v832_v4, %v787_v47 }
 0x110   : > { %v862_v18 = vadd.f32 %v1601_v15, %v850_v14 }
 0x111   : > { %v708_v19 = vpop.f32.mrf.mxu2  ;;  %v772_v50 = vpop.f32.mrf.mxu3 }
 0x112   : > { %v870_v21 = vmax.f32 %v862_v18, 0.0  ;;  %v724_v24 = vadd.f32 %v708_v19, %v664_v17  ;;  %v651_v26 = vpop.f32.mrf.mxu1 }
 0x113   : > { %v665_v31 = vadd.f32 %v651_v26, %v602_v48 }
 0x114   : > { %878 = vst [vmem:[%s1607_s9 + $0x18] sm:$0xff] %v870_v21  ;;  %v788_v51 = vadd.f32 %v772_v50, %v724_v24 }
 0x115   : > { %v838_v28 = vpop.f32.mrf.mxu0 }
 0x116   : > { %v851_v27 = vadd.f32 %v835_v44, %v788_v51 }
 0x118   : > { %v863_v16 = vadd.f32 %v1601_v15, %v851_v27 }
 0x119   : > { %v711_v32 = vpop.f32.mrf.mxu2  ;;  %v775_v54 = vpop.f32.mrf.mxu3 }
 0x11a   : > { %v871_v34 = vmax.f32 %v863_v16, 0.0  ;;  %v725_v35 = vadd.f32 %v711_v32, %v665_v31  ;;  %v654_v23 = vpop.f32.mrf.mxu1 }
 0x11b   : > { %v666_v38 = vadd.f32 %v654_v23, %v603_v57 }
 0x11c   : > { %879 = vst [vmem:[%s1607_s9 + $0x20] sm:$0xff] %v871_v34  ;;  %v789_v52 = vadd.f32 %v775_v54, %v725_v35 }
 0x11d   : > { %v841_v41 = vpop.f32.mrf.mxu0 }
 0x11e   : > { %v852_v37 = vadd.f32 %v838_v28, %v789_v52 }
 0x120   : > { %v864_v39 = vadd.f32 %v1601_v15, %v852_v37 }
 0x121   : > { %v714_v58 = vpop.f32.mrf.mxu2  ;;  %v778_v60 = vpop.f32.mrf.mxu3 }
 0x122   : > { %v872_v62 = vmax.f32 %v864_v39, 0.0  ;;  %v726_v1 = vadd.f32 %v714_v58, %v666_v38  ;;  %v657_v59 = vpop.f32.mrf.mxu1 }
 0x123   : > { %v667_v2 = vadd.f32 %v657_v59, %v604_v56 }
 0x124   : > { %880 = vst [vmem:[%s1607_s9 + $0x28] sm:$0xff] %v872_v62  ;;  %v790_v30 = vadd.f32 %v778_v60, %v726_v1 }
 0x125   : > { %v844_v40 = vpop.f32.mrf.mxu0 }
 0x126   : > { %v853_v63 = vadd.f32 %v841_v41, %v790_v30 }
 0x128   : > { %v865_v3 = vadd.f32 %v1601_v15, %v853_v63 }
 0x129   : > { %v717_v25 = vpop.f32.mrf.mxu2  ;;  %v781_v43 = vpop.f32.mrf.mxu3 }
 0x12a   : > { %v873_v4 = vmax.f32 %v865_v3, 0.0  ;;  %v727_v0 = vadd.f32 %v717_v25, %v667_v2 }
 0x12c   : > { %881 = vst [vmem:[%s1607_s9 + $0x30] sm:$0xff] %v873_v4  ;;  %v791_v45 = vadd.f32 %v781_v43, %v727_v0 }
 0x12e   : > { %v854_v61 = vadd.f32 %v844_v40, %v791_v45 }
 0x130   : > { %v866_v5 = vadd.f32 %v1601_v15, %v854_v61 }
 0x132   : > { %v874_v6 = vmax.f32 %v866_v5, 0.0 }
 0x134   : > { %882 = vst [vmem:[%s1607_s9 + $0x38] sm:$0xff] %v874_v6 }
 0x135   : > { %1192 = shalt.err (!%p1189_p5)
}
 0x136   : > { %s1245_s5 = smov 128   ;;  %s1246_s7 = smov 8  }
 0x137   : > { %1107 = dma.vmem_to_hbm [thread:$0]  (%p1307_p4), %s898_s21, 1024, %s900_s23, %s884_s15, %s1245_s5, %s1245_s5, %s1246_s7  }
 0x138 PF: > { %p1113_p6 = scmp.ge.s32.totalorder %s1243_s17, 2  ;;  %s914_s8 = sand.u32 1, %s1223_s12  }
 0x139   : > { %s915_s9 = scalar_lea.sflag [#allocation3], %s914_s8 }
 0x13a   : > { %p1110_p7 = pnand %p1113_p6, %p1314_p8 }
 0x13c   : > { %p1111_p9 = pneg %p1110_p7 }
 0x13e   : > { %1218 = dma.done.wait (%p1111_p9), %s915_s9, 1024  }
 0x13f   : > { %1220 = vsyncadd (%p1111_p9), %s915_s9, 4294966272  ;;  %s16_s17 = sadd.s32 1, %s1243_s17   ;;  %s1690_s12 = smov %s1227_s13 }
 0x140   : > { %p13_p10 = scmp.ge.s32.totalorder %s16_s17, 10   ;;  %s1691_s13 = smov %s1231_s14 }
 0x141   : > { %s1692_s14 = smov %s1320_s25  ;;  %s1693_s15 = smov %s1239_s16 }
 0x142   : > { %s1694_s16 = smov %s1696_s20  ;;  %15 = sbr.rel (!%p13_p10) target bundleno = 4 (0x4), region = 81 }
 0x147   :  { %921 = vsyncpa [#allocation3], 1 }
 0x148   :  { %923 = vsyncpa [#allocation3 + $0x1], 1 }

</bundles_post_ra>
